<compile_context>
chip_gen: v7x
topology: tpu7x:2x2x1
jax: 0.10.0
libtpu: 0.0.40
codegen_flags: <defaults>
</compile_context>

<pallas_src>
import functools

import numpy as np

import jax
import jax.numpy as jnp
from jax.experimental import pallas as pl
from jax.experimental.pallas import tpu as pltpu


# ----------------------------------------------------------------------------
# Fused Pallas kernel: all LSTM layers + FC head, single invocation, no grid.
# ----------------------------------------------------------------------------
def _fused_lstm_classifier_kernel(x_ref, wih0_ref, whh0_ref, b0_ref, *refs,
                                  seq_len, batch, hidden, num_layers):
    """refs = (w_stk_1, b_1, ..., w_stk_{L-1}, b_{L-1}, fc_w, fc_b, out).

    x_ref    : (T*B, I)   time-major flattened input sequence (bf16)
    wih0_ref : (I, 4H)    layer-0 input weight, transposed (bf16)
    whh0_ref : (H, 4H)    layer-0 recurrent weight, transposed (bf16)
    b0_ref   : (1, 4H)    layer-0 bias (= bias_ih + bias_hh, f32)
    w_stk_l  : (2H, 4H)   [W_ih_l^T ; W_hh_l^T] stacked (bf16), l >= 1
    b_l      : (1, 4H)    (f32)
    fc_w     : (1, H), fc_b : (1, 1)   (f32)
    out      : (B, 1)     (f32)
    """
    out_ref = refs[-1]
    fcb_ref = refs[-2]
    fcw_ref = refs[-3]
    hi_refs = refs[:2 * (num_layers - 1)]

    T, B, H = seq_len, batch, hidden
    bf16 = jnp.bfloat16

    # Hoisted layer-0 input projection (bias folded in): one well-shaped MXU
    # matmul for the whole sequence instead of T tiny ones in the recurrence.
    gx0 = (jnp.dot(x_ref[...], wih0_ref[...],
                   preferred_element_type=jnp.float32)
           + b0_ref[...])                                          # (T*B, 4H) f32

    # Grid-invariant weights loaded once as values (tiny at this size).
    whh0 = whh0_ref[...]                                           # (H, 4H) bf16
    w_stk = [hi_refs[2 * j][...] for j in range(num_layers - 1)]   # (2H,4H) bf16
    # Pre-broadcast higher-layer biases ONCE (no broadcast_in_dim per step).
    b_hi = [jnp.broadcast_to(hi_refs[2 * j + 1][...], (B, 4 * H))
            for j in range(num_layers - 1)]                        # (B, 4H) f32

    def act(gates):
        # Full-slab nonlinearities: 2 EUP pushes per cell instead of 4, and
        # the operands of the pushes are whole (8,128) slabs (no lane-offset
        # relayout before the push).  PyTorch gate order: i, f, g, o.
        sig = jax.nn.sigmoid(gates)
        tnh = jnp.tanh(gates)
        return (sig[:, 0 * H:1 * H], sig[:, 1 * H:2 * H],
                tnh[:, 2 * H:3 * H], sig[:, 3 * H:4 * H])

    def cell(gates, c_prev):
        i_g, f_g, g_g, o_g = act(gates)
        c_new = f_g * c_prev + i_g * g_g
        return o_g * jnp.tanh(c_new), c_new

    def cell_t0(gates):
        # h_prev == c_prev == 0: the forget-gate term vanishes.
        i_g, _, g_g, o_g = act(gates)
        c_new = i_g * g_g
        return o_g * jnp.tanh(c_new), c_new

    h = [None] * num_layers
    c = [None] * num_layers

    # ---- t = 0 peeled: skip every h @ W_hh matmul and every f*c_prev term.
    h[0], c[0] = cell_t0(gx0[0:B, :])
    for l in range(1, num_layers):
        gates = (jnp.dot(h[l - 1].astype(bf16), w_stk[l - 1][:H, :],
                         preferred_element_type=jnp.float32)
                 + b_hi[l - 1])
        h[l], c[l] = cell_t0(gates)

    # ---- t = 1 .. T-1, fully unrolled (T is small and static, equivalent to
    # lax.fori_loop(..., unroll=True); every slice below is static and
    # (8,128)-aligned thanks to the batch padding).
    for t in range(1, T):
        # Layer 0: precomputed input gates + recurrent term.
        gates0 = (gx0[t * B:(t + 1) * B, :]
                  + jnp.dot(h[0].astype(bf16), whh0,
                            preferred_element_type=jnp.float32))
        h[0], c[0] = cell(gates0, c[0])
        # Layers > 0 in lockstep on the fresh h below; the two matmuls are
        # fused into a single MXU push via the stacked (2H, 4H) weight.
        for l in range(1, num_layers):
            hin = jnp.concatenate([h[l - 1], h[l]], axis=-1).astype(bf16)
            gates = (jnp.dot(hin, w_stk[l - 1],
                             preferred_element_type=jnp.float32)
                     + b_hi[l - 1])
            h[l], c[l] = cell(gates, c[l])

    # Final Linear(hidden, 1) as a VPU multiply + cross-lane reduction.
    logit = (jnp.sum(h[num_layers - 1] * fcw_ref[...], axis=-1, keepdims=True)
             + fcb_ref[...])                                        # (B, 1)
    out_ref[...] = logit.astype(out_ref.dtype)


# ----------------------------------------------------------------------------
# Wrapper
# ----------------------------------------------------------------------------
def lstm_classifier_extrema_forward(x_seq, lstm_params, fc_w, fc_b):
    """x_seq: (B, T, input_size) batch-first, like the PyTorch module.

    lstm_params: list of (w_ih, w_hh, bias) per layer (PyTorch shapes:
    w_ih (4H, in), w_hh (4H, H), bias = bias_ih + bias_hh (4H,)).
    Returns logits of shape (B,) (squeeze(-1) of the fc output).
    """
    B, T, I = x_seq.shape
    H = lstm_params[0][1].shape[1]
    num_layers = len(lstm_params)

    # Pad batch to the f32 sublane multiple so every per-step tensor in the
    # kernel is (8,128)-aligned.  Padded rows are zero and dropped at the end.
    B_pad = max(8, ((B + 7) // 8) * 8)
    x = x_seq.astype(jnp.float32)
    if B_pad != B:
        x = jnp.pad(x, ((0, B_pad - B), (0, 0), (0, 0)))

    # Time-major + flattened so the layer-0 input projection is one matmul.
    # bf16 MXU operands (single native MXU pass), f32 accumulation in-kernel.
    x_flat = (jnp.transpose(x, (1, 0, 2))
              .reshape(T * B_pad, I).astype(jnp.bfloat16))

    ins = [x_flat]
    w_ih0, w_hh0, b0 = lstm_params[0]
    ins.append(jnp.asarray(w_ih0.T, jnp.float32).astype(jnp.bfloat16))  # (I, 4H)
    ins.append(jnp.asarray(w_hh0.T, jnp.float32).astype(jnp.bfloat16))  # (H, 4H)
    ins.append(jnp.asarray(b0, jnp.float32).reshape(1, 4 * H))          # (1, 4H)
    for (w_ih, w_hh, bias) in lstm_params[1:]:
        # Stacked [W_ih^T ; W_hh^T] so the per-step gates need one matmul.
        w_stk = jnp.concatenate([jnp.asarray(w_ih.T, jnp.float32),
                                 jnp.asarray(w_hh.T, jnp.float32)], axis=0)
        ins.append(w_stk.astype(jnp.bfloat16))                          # (2H, 4H)
        ins.append(jnp.asarray(bias, jnp.float32).reshape(1, 4 * H))    # (1, 4H)
    ins.append(jnp.asarray(fc_w, jnp.float32).reshape(1, H))            # (1, H)
    ins.append(jnp.asarray(fc_b, jnp.float32).reshape(1, 1))            # (1, 1)

    kernel = functools.partial(_fused_lstm_classifier_kernel,
                               seq_len=T, batch=B_pad, hidden=H,
                               num_layers=num_layers)

    # Advisory cost estimate for XLA scheduling around this tiny custom call.
    fl = 2 * T * B_pad * I * 4 * H                                # input proj
    fl += 2 * (T - 1) * B_pad * H * 4 * H                         # layer-0 rec
    fl += 2 * B_pad * H * 4 * H * (num_layers - 1)                # t=0 upper
    fl += 2 * (T - 1) * B_pad * (2 * H) * 4 * H * (num_layers - 1)
    fl += 2 * B_pad * H                                           # fc head
    tr = T * num_layers * B_pad * (2 * 4 * H + H)
    by = sum(int(a.size) * a.dtype.itemsize for a in ins) + B_pad * 4
    cost = pl.CostEstimate(flops=int(fl), transcendentals=int(tr),
                           bytes_accessed=int(by))

    vmem_spec = pl.BlockSpec(memory_space=pltpu.MemorySpace.VMEM)
    logit = pl.pallas_call(
        kernel,
        out_shape=jax.ShapeDtypeStruct((B_pad, 1), jnp.float32),
        in_specs=[vmem_spec] * len(ins),
        out_specs=vmem_spec,
        cost_estimate=cost,
    )(*ins)
    return logit[:B, 0]


# ----------------------------------------------------------------------------
# Pure-JAX reference (mirrors torch.nn.LSTM + Linear eval semantics, f32)
# ----------------------------------------------------------------------------
def _reference_forward(x_seq, lstm_params, fc_w, fc_b):
    B, T, _ = x_seq.shape
    h_seq = x_seq.astype(jnp.float32)
    for (w_ih, w_hh, bias) in lstm_params:
        H = w_hh.shape[1]
        h = jnp.zeros((B, H), jnp.float32)
        c = jnp.zeros((B, H), jnp.float32)
        outs = []
        for t in range(T):
            gates = h_seq[:, t] @ w_ih.T + h @ w_hh.T + bias
            i_g = jax.nn.sigmoid(gates[:, 0 * H:1 * H])
            f_g = jax.nn.sigmoid(gates[:, 1 * H:2 * H])
            g_g = jnp.tanh(gates[:, 2 * H:3 * H])
            o_g = jax.nn.sigmoid(gates[:, 3 * H:4 * H])
            c = f_g * c + i_g * g_g
            h = o_g * jnp.tanh(c)
            outs.append(h)
        h_seq = jnp.stack(outs, axis=1)
    last = h_seq[:, -1]
    return (last @ fc_w.T + fc_b).squeeze(-1)


# ----------------------------------------------------------------------------
# Deterministic parameter construction (matches __init__ shapes & init scheme)
# ----------------------------------------------------------------------------
def make_params(key, input_size, hidden_size, num_layers):
    xavier = jax.nn.initializers.xavier_uniform()
    ortho = jax.nn.initializers.orthogonal()
    lstm_params = []
    for layer in range(num_layers):
        in_sz = input_size if layer == 0 else hidden_size
        key, k1, k2 = jax.random.split(key, 3)
        w_ih = xavier(k1, (4 * hidden_size, in_sz), jnp.float32)       # xavier_uniform_
        w_hh = ortho(k2, (4 * hidden_size, hidden_size), jnp.float32)  # orthogonal_
        # NOTE: if loading real PyTorch weights, pass bias_ih + bias_hh here.
        bias = jnp.zeros((4 * hidden_size,), jnp.float32)              # zeros init
        lstm_params.append((w_ih, w_hh, bias))
    key, k3 = jax.random.split(key)
    fc_w = xavier(k3, (1, hidden_size), jnp.float32)
    fc_b = jnp.zeros((1,), jnp.float32)
    return lstm_params, fc_w, fc_b


# ----------------------------------------------------------------------------
if __name__ == "__main__":
    input_size = 16
    hidden_size = 32
    num_layers = 2
    batch = 2
    seq_len = 8

    key = jax.random.PRNGKey(0)
    key, kx = jax.random.split(key)
    x_seq = jax.random.normal(kx, (batch, seq_len, input_size), jnp.float32)

    lstm_params, fc_w, fc_b = make_params(key, input_size, hidden_size, num_layers)

    logits = lstm_classifier_extrema_forward(x_seq, lstm_params, fc_w, fc_b)
    logits = jax.block_until_ready(logits)

    ref = _reference_forward(x_seq, lstm_params, fc_w, fc_b)
    assert logits.shape == (batch,), logits.shape
    # bf16 MXU operands (f32 accumulation) → tolerance vs the f32 reference
    # loosens from 1e-5 to ~1e-2.
    err = float(jnp.max(jnp.abs(logits - ref)))
    assert err < 5e-2, (err, logits, ref)

    print("KERNEL_OK")
</pallas_src>

<mosaic_0001>
module attributes {stable_mosaic.version = 11 : i64} {
  func.func @_fused_lstm_classifier_kernel(%arg0: memref<64x16xbf16, #tpu.memory_space<vmem>>, %arg1: memref<16x128xbf16, #tpu.memory_space<vmem>>, %arg2: memref<32x128xbf16, #tpu.memory_space<vmem>>, %arg3: memref<1x128xf32, #tpu.memory_space<vmem>>, %arg4: memref<64x128xbf16, #tpu.memory_space<vmem>>, %arg5: memref<1x128xf32, #tpu.memory_space<vmem>>, %arg6: memref<1x32xf32, #tpu.memory_space<vmem>>, %arg7: memref<1x1xf32, #tpu.memory_space<vmem>>, %arg8: memref<8x1xf32, #tpu.memory_space<vmem>>) attributes {dimension_semantics = [], scalar_prefetch = 0 : i64, scratch_operands = 0 : i64, tpu.core_type = #tpu.core_type<tc>} {
    %c0 = arith.constant 0 : index
    %c0_0 = arith.constant 0 : index
    %0 = vector.load %arg0[%c0, %c0_0] : memref<64x16xbf16, #tpu.memory_space<vmem>>, vector<64x16xbf16>
    %c0_1 = arith.constant 0 : index
    %c0_2 = arith.constant 0 : index
    %1 = vector.load %arg1[%c0_1, %c0_2] : memref<16x128xbf16, #tpu.memory_space<vmem>>, vector<16x128xbf16>
    %cst = arith.constant dense<0.000000e+00> : vector<64x128xf32>
    %2 = tpu.matmul %0, %1, %cst {dimension_numbers = #tpu.dot_dimension_numbers<[1], [0], [0], [1], [0, 0, 1, 1], [], []>} : vector<64x16xbf16>, vector<16x128xbf16>, vector<64x128xf32> -> vector<64x128xf32>
    %c0_3 = arith.constant 0 : index
    %c0_4 = arith.constant 0 : index
    %3 = vector.load %arg3[%c0_3, %c0_4] : memref<1x128xf32, #tpu.memory_space<vmem>>, vector<1x128xf32>
    %4 = vector.broadcast %3 : vector<1x128xf32> to vector<64x128xf32>
    %5 = arith.addf %2, %4 : vector<64x128xf32>
    %c0_5 = arith.constant 0 : index
    %c0_6 = arith.constant 0 : index
    %6 = vector.load %arg2[%c0_5, %c0_6] : memref<32x128xbf16, #tpu.memory_space<vmem>>, vector<32x128xbf16>
    %c0_7 = arith.constant 0 : index
    %c0_8 = arith.constant 0 : index
    %7 = vector.load %arg4[%c0_7, %c0_8] : memref<64x128xbf16, #tpu.memory_space<vmem>>, vector<64x128xbf16>
    %c0_9 = arith.constant 0 : index
    %c0_10 = arith.constant 0 : index
    %8 = vector.load %arg5[%c0_9, %c0_10] : memref<1x128xf32, #tpu.memory_space<vmem>>, vector<1x128xf32>
    %9 = vector.shape_cast %8 : vector<1x128xf32> to vector<1x128xf32>
    %10 = vector.broadcast %9 : vector<1x128xf32> to vector<8x128xf32>
    %11 = vector.extract_strided_slice %5 {offsets = [0, 0], sizes = [8, 128], strides = [1, 1]} : vector<64x128xf32> to vector<8x128xf32>
    %12 = arith.negf %11 : vector<8x128xf32>
    %13 = math.exp %12 : vector<8x128xf32>
    %cst_11 = arith.constant 1.000000e+00 : f32
    %14 = vector.broadcast %cst_11 : f32 to vector<8x128xf32>
    %15 = arith.addf %14, %13 : vector<8x128xf32>
    %16 = arith.divf %14, %15 : vector<8x128xf32>
    %17 = math.tanh %11 : vector<8x128xf32>
    %18 = vector.extract_strided_slice %16 {offsets = [0, 0], sizes = [8, 32], strides = [1, 1]} : vector<8x128xf32> to vector<8x32xf32>
    %19 = vector.extract_strided_slice %17 {offsets = [0, 64], sizes = [8, 32], strides = [1, 1]} : vector<8x128xf32> to vector<8x32xf32>
    %20 = vector.extract_strided_slice %16 {offsets = [0, 96], sizes = [8, 32], strides = [1, 1]} : vector<8x128xf32> to vector<8x32xf32>
    %21 = arith.mulf %18, %19 : vector<8x32xf32>
    %22 = math.tanh %21 : vector<8x32xf32>
    %23 = arith.mulf %20, %22 : vector<8x32xf32>
    %24 = arith.truncf %23 : vector<8x32xf32> to vector<8x32xbf16>
    %25 = vector.extract_strided_slice %7 {offsets = [0, 0], sizes = [32, 128], strides = [1, 1]} : vector<64x128xbf16> to vector<32x128xbf16>
    %cst_12 = arith.constant dense<0.000000e+00> : vector<8x128xf32>
    %26 = tpu.matmul %24, %25, %cst_12 {dimension_numbers = #tpu.dot_dimension_numbers<[1], [0], [0], [1], [0, 0, 1, 1], [], []>} : vector<8x32xbf16>, vector<32x128xbf16>, vector<8x128xf32> -> vector<8x128xf32>
    %27 = arith.addf %26, %10 : vector<8x128xf32>
    %28 = arith.negf %27 : vector<8x128xf32>
    %29 = math.exp %28 : vector<8x128xf32>
    %cst_13 = arith.constant 1.000000e+00 : f32
    %30 = vector.broadcast %cst_13 : f32 to vector<8x128xf32>
    %31 = arith.addf %30, %29 : vector<8x128xf32>
    %32 = arith.divf %30, %31 : vector<8x128xf32>
    %33 = math.tanh %27 : vector<8x128xf32>
    %34 = vector.extract_strided_slice %32 {offsets = [0, 0], sizes = [8, 32], strides = [1, 1]} : vector<8x128xf32> to vector<8x32xf32>
    %35 = vector.extract_strided_slice %33 {offsets = [0, 64], sizes = [8, 32], strides = [1, 1]} : vector<8x128xf32> to vector<8x32xf32>
    %36 = vector.extract_strided_slice %32 {offsets = [0, 96], sizes = [8, 32], strides = [1, 1]} : vector<8x128xf32> to vector<8x32xf32>
    %37 = arith.mulf %34, %35 : vector<8x32xf32>
    %38 = math.tanh %37 : vector<8x32xf32>
    %39 = arith.mulf %36, %38 : vector<8x32xf32>
    %40 = vector.extract_strided_slice %5 {offsets = [8, 0], sizes = [8, 128], strides = [1, 1]} : vector<64x128xf32> to vector<8x128xf32>
    %41 = arith.truncf %23 : vector<8x32xf32> to vector<8x32xbf16>
    %cst_14 = arith.constant dense<0.000000e+00> : vector<8x128xf32>
    %42 = tpu.matmul %41, %6, %cst_14 {dimension_numbers = #tpu.dot_dimension_numbers<[1], [0], [0], [1], [0, 0, 1, 1], [], []>} : vector<8x32xbf16>, vector<32x128xbf16>, vector<8x128xf32> -> vector<8x128xf32>
    %43 = arith.addf %40, %42 : vector<8x128xf32>
    %44 = arith.negf %43 : vector<8x128xf32>
    %45 = math.exp %44 : vector<8x128xf32>
    %cst_15 = arith.constant 1.000000e+00 : f32
    %46 = vector.broadcast %cst_15 : f32 to vector<8x128xf32>
    %47 = arith.addf %46, %45 : vector<8x128xf32>
    %48 = arith.divf %46, %47 : vector<8x128xf32>
    %49 = math.tanh %43 : vector<8x128xf32>
    %50 = vector.extract_strided_slice %48 {offsets = [0, 0], sizes = [8, 32], strides = [1, 1]} : vector<8x128xf32> to vector<8x32xf32>
    %51 = vector.extract_strided_slice %48 {offsets = [0, 32], sizes = [8, 32], strides = [1, 1]} : vector<8x128xf32> to vector<8x32xf32>
    %52 = vector.extract_strided_slice %49 {offsets = [0, 64], sizes = [8, 32], strides = [1, 1]} : vector<8x128xf32> to vector<8x32xf32>
    %53 = vector.extract_strided_slice %48 {offsets = [0, 96], sizes = [8, 32], strides = [1, 1]} : vector<8x128xf32> to vector<8x32xf32>
    %54 = arith.mulf %51, %21 : vector<8x32xf32>
    %55 = arith.mulf %50, %52 : vector<8x32xf32>
    %56 = arith.addf %54, %55 : vector<8x32xf32>
    %57 = math.tanh %56 : vector<8x32xf32>
    %58 = arith.mulf %53, %57 : vector<8x32xf32>
    %59 = tpu.concatenate %58, %39 in 1 : vector<8x32xf32>, vector<8x32xf32> -> vector<8x64xf32>
    %60 = arith.truncf %59 : vector<8x64xf32> to vector<8x64xbf16>
    %cst_16 = arith.constant dense<0.000000e+00> : vector<8x128xf32>
    %61 = tpu.matmul %60, %7, %cst_16 {dimension_numbers = #tpu.dot_dimension_numbers<[1], [0], [0], [1], [0, 0, 1, 1], [], []>} : vector<8x64xbf16>, vector<64x128xbf16>, vector<8x128xf32> -> vector<8x128xf32>
    %62 = arith.addf %61, %10 : vector<8x128xf32>
    %63 = arith.negf %62 : vector<8x128xf32>
    %64 = math.exp %63 : vector<8x128xf32>
    %cst_17 = arith.constant 1.000000e+00 : f32
    %65 = vector.broadcast %cst_17 : f32 to vector<8x128xf32>
    %66 = arith.addf %65, %64 : vector<8x128xf32>
    %67 = arith.divf %65, %66 : vector<8x128xf32>
    %68 = math.tanh %62 : vector<8x128xf32>
    %69 = vector.extract_strided_slice %67 {offsets = [0, 0], sizes = [8, 32], strides = [1, 1]} : vector<8x128xf32> to vector<8x32xf32>
    %70 = vector.extract_strided_slice %67 {offsets = [0, 32], sizes = [8, 32], strides = [1, 1]} : vector<8x128xf32> to vector<8x32xf32>
    %71 = vector.extract_strided_slice %68 {offsets = [0, 64], sizes = [8, 32], strides = [1, 1]} : vector<8x128xf32> to vector<8x32xf32>
    %72 = vector.extract_strided_slice %67 {offsets = [0, 96], sizes = [8, 32], strides = [1, 1]} : vector<8x128xf32> to vector<8x32xf32>
    %73 = arith.mulf %70, %37 : vector<8x32xf32>
    %74 = arith.mulf %69, %71 : vector<8x32xf32>
    %75 = arith.addf %73, %74 : vector<8x32xf32>
    %76 = math.tanh %75 : vector<8x32xf32>
    %77 = arith.mulf %72, %76 : vector<8x32xf32>
    %78 = vector.extract_strided_slice %5 {offsets = [16, 0], sizes = [8, 128], strides = [1, 1]} : vector<64x128xf32> to vector<8x128xf32>
    %79 = arith.truncf %58 : vector<8x32xf32> to vector<8x32xbf16>
    %cst_18 = arith.constant dense<0.000000e+00> : vector<8x128xf32>
    %80 = tpu.matmul %79, %6, %cst_18 {dimension_numbers = #tpu.dot_dimension_numbers<[1], [0], [0], [1], [0, 0, 1, 1], [], []>} : vector<8x32xbf16>, vector<32x128xbf16>, vector<8x128xf32> -> vector<8x128xf32>
    %81 = arith.addf %78, %80 : vector<8x128xf32>
    %82 = arith.negf %81 : vector<8x128xf32>
    %83 = math.exp %82 : vector<8x128xf32>
    %cst_19 = arith.constant 1.000000e+00 : f32
    %84 = vector.broadcast %cst_19 : f32 to vector<8x128xf32>
    %85 = arith.addf %84, %83 : vector<8x128xf32>
    %86 = arith.divf %84, %85 : vector<8x128xf32>
    %87 = math.tanh %81 : vector<8x128xf32>
    %88 = vector.extract_strided_slice %86 {offsets = [0, 0], sizes = [8, 32], strides = [1, 1]} : vector<8x128xf32> to vector<8x32xf32>
    %89 = vector.extract_strided_slice %86 {offsets = [0, 32], sizes = [8, 32], strides = [1, 1]} : vector<8x128xf32> to vector<8x32xf32>
    %90 = vector.extract_strided_slice %87 {offsets = [0, 64], sizes = [8, 32], strides = [1, 1]} : vector<8x128xf32> to vector<8x32xf32>
    %91 = vector.extract_strided_slice %86 {offsets = [0, 96], sizes = [8, 32], strides = [1, 1]} : vector<8x128xf32> to vector<8x32xf32>
    %92 = arith.mulf %89, %56 : vector<8x32xf32>
    %93 = arith.mulf %88, %90 : vector<8x32xf32>
    %94 = arith.addf %92, %93 : vector<8x32xf32>
    %95 = math.tanh %94 : vector<8x32xf32>
    %96 = arith.mulf %91, %95 : vector<8x32xf32>
    %97 = tpu.concatenate %96, %77 in 1 : vector<8x32xf32>, vector<8x32xf32> -> vector<8x64xf32>
    %98 = arith.truncf %97 : vector<8x64xf32> to vector<8x64xbf16>
    %cst_20 = arith.constant dense<0.000000e+00> : vector<8x128xf32>
    %99 = tpu.matmul %98, %7, %cst_20 {dimension_numbers = #tpu.dot_dimension_numbers<[1], [0], [0], [1], [0, 0, 1, 1], [], []>} : vector<8x64xbf16>, vector<64x128xbf16>, vector<8x128xf32> -> vector<8x128xf32>
    %100 = arith.addf %99, %10 : vector<8x128xf32>
    %101 = arith.negf %100 : vector<8x128xf32>
    %102 = math.exp %101 : vector<8x128xf32>
    %cst_21 = arith.constant 1.000000e+00 : f32
    %103 = vector.broadcast %cst_21 : f32 to vector<8x128xf32>
    %104 = arith.addf %103, %102 : vector<8x128xf32>
    %105 = arith.divf %103, %104 : vector<8x128xf32>
    %106 = math.tanh %100 : vector<8x128xf32>
    %107 = vector.extract_strided_slice %105 {offsets = [0, 0], sizes = [8, 32], strides = [1, 1]} : vector<8x128xf32> to vector<8x32xf32>
    %108 = vector.extract_strided_slice %105 {offsets = [0, 32], sizes = [8, 32], strides = [1, 1]} : vector<8x128xf32> to vector<8x32xf32>
    %109 = vector.extract_strided_slice %106 {offsets = [0, 64], sizes = [8, 32], strides = [1, 1]} : vector<8x128xf32> to vector<8x32xf32>
    %110 = vector.extract_strided_slice %105 {offsets = [0, 96], sizes = [8, 32], strides = [1, 1]} : vector<8x128xf32> to vector<8x32xf32>
    %111 = arith.mulf %108, %75 : vector<8x32xf32>
    %112 = arith.mulf %107, %109 : vector<8x32xf32>
    %113 = arith.addf %111, %112 : vector<8x32xf32>
    %114 = math.tanh %113 : vector<8x32xf32>
    %115 = arith.mulf %110, %114 : vector<8x32xf32>
    %116 = vector.extract_strided_slice %5 {offsets = [24, 0], sizes = [8, 128], strides = [1, 1]} : vector<64x128xf32> to vector<8x128xf32>
    %117 = arith.truncf %96 : vector<8x32xf32> to vector<8x32xbf16>
    %cst_22 = arith.constant dense<0.000000e+00> : vector<8x128xf32>
    %118 = tpu.matmul %117, %6, %cst_22 {dimension_numbers = #tpu.dot_dimension_numbers<[1], [0], [0], [1], [0, 0, 1, 1], [], []>} : vector<8x32xbf16>, vector<32x128xbf16>, vector<8x128xf32> -> vector<8x128xf32>
    %119 = arith.addf %116, %118 : vector<8x128xf32>
    %120 = arith.negf %119 : vector<8x128xf32>
    %121 = math.exp %120 : vector<8x128xf32>
    %cst_23 = arith.constant 1.000000e+00 : f32
    %122 = vector.broadcast %cst_23 : f32 to vector<8x128xf32>
    %123 = arith.addf %122, %121 : vector<8x128xf32>
    %124 = arith.divf %122, %123 : vector<8x128xf32>
    %125 = math.tanh %119 : vector<8x128xf32>
    %126 = vector.extract_strided_slice %124 {offsets = [0, 0], sizes = [8, 32], strides = [1, 1]} : vector<8x128xf32> to vector<8x32xf32>
    %127 = vector.extract_strided_slice %124 {offsets = [0, 32], sizes = [8, 32], strides = [1, 1]} : vector<8x128xf32> to vector<8x32xf32>
    %128 = vector.extract_strided_slice %125 {offsets = [0, 64], sizes = [8, 32], strides = [1, 1]} : vector<8x128xf32> to vector<8x32xf32>
    %129 = vector.extract_strided_slice %124 {offsets = [0, 96], sizes = [8, 32], strides = [1, 1]} : vector<8x128xf32> to vector<8x32xf32>
    %130 = arith.mulf %127, %94 : vector<8x32xf32>
    %131 = arith.mulf %126, %128 : vector<8x32xf32>
    %132 = arith.addf %130, %131 : vector<8x32xf32>
    %133 = math.tanh %132 : vector<8x32xf32>
    %134 = arith.mulf %129, %133 : vector<8x32xf32>
    %135 = tpu.concatenate %134, %115 in 1 : vector<8x32xf32>, vector<8x32xf32> -> vector<8x64xf32>
    %136 = arith.truncf %135 : vector<8x64xf32> to vector<8x64xbf16>
    %cst_24 = arith.constant dense<0.000000e+00> : vector<8x128xf32>
    %137 = tpu.matmul %136, %7, %cst_24 {dimension_numbers = #tpu.dot_dimension_numbers<[1], [0], [0], [1], [0, 0, 1, 1], [], []>} : vector<8x64xbf16>, vector<64x128xbf16>, vector<8x128xf32> -> vector<8x128xf32>
    %138 = arith.addf %137, %10 : vector<8x128xf32>
    %139 = arith.negf %138 : vector<8x128xf32>
    %140 = math.exp %139 : vector<8x128xf32>
    %cst_25 = arith.constant 1.000000e+00 : f32
    %141 = vector.broadcast %cst_25 : f32 to vector<8x128xf32>
    %142 = arith.addf %141, %140 : vector<8x128xf32>
    %143 = arith.divf %141, %142 : vector<8x128xf32>
    %144 = math.tanh %138 : vector<8x128xf32>
    %145 = vector.extract_strided_slice %143 {offsets = [0, 0], sizes = [8, 32], strides = [1, 1]} : vector<8x128xf32> to vector<8x32xf32>
    %146 = vector.extract_strided_slice %143 {offsets = [0, 32], sizes = [8, 32], strides = [1, 1]} : vector<8x128xf32> to vector<8x32xf32>
    %147 = vector.extract_strided_slice %144 {offsets = [0, 64], sizes = [8, 32], strides = [1, 1]} : vector<8x128xf32> to vector<8x32xf32>
    %148 = vector.extract_strided_slice %143 {offsets = [0, 96], sizes = [8, 32], strides = [1, 1]} : vector<8x128xf32> to vector<8x32xf32>
    %149 = arith.mulf %146, %113 : vector<8x32xf32>
    %150 = arith.mulf %145, %147 : vector<8x32xf32>
    %151 = arith.addf %149, %150 : vector<8x32xf32>
    %152 = math.tanh %151 : vector<8x32xf32>
    %153 = arith.mulf %148, %152 : vector<8x32xf32>
    %154 = vector.extract_strided_slice %5 {offsets = [32, 0], sizes = [8, 128], strides = [1, 1]} : vector<64x128xf32> to vector<8x128xf32>
    %155 = arith.truncf %134 : vector<8x32xf32> to vector<8x32xbf16>
    %cst_26 = arith.constant dense<0.000000e+00> : vector<8x128xf32>
    %156 = tpu.matmul %155, %6, %cst_26 {dimension_numbers = #tpu.dot_dimension_numbers<[1], [0], [0], [1], [0, 0, 1, 1], [], []>} : vector<8x32xbf16>, vector<32x128xbf16>, vector<8x128xf32> -> vector<8x128xf32>
    %157 = arith.addf %154, %156 : vector<8x128xf32>
    %158 = arith.negf %157 : vector<8x128xf32>
    %159 = math.exp %158 : vector<8x128xf32>
    %cst_27 = arith.constant 1.000000e+00 : f32
    %160 = vector.broadcast %cst_27 : f32 to vector<8x128xf32>
    %161 = arith.addf %160, %159 : vector<8x128xf32>
    %162 = arith.divf %160, %161 : vector<8x128xf32>
    %163 = math.tanh %157 : vector<8x128xf32>
    %164 = vector.extract_strided_slice %162 {offsets = [0, 0], sizes = [8, 32], strides = [1, 1]} : vector<8x128xf32> to vector<8x32xf32>
    %165 = vector.extract_strided_slice %162 {offsets = [0, 32], sizes = [8, 32], strides = [1, 1]} : vector<8x128xf32> to vector<8x32xf32>
    %166 = vector.extract_strided_slice %163 {offsets = [0, 64], sizes = [8, 32], strides = [1, 1]} : vector<8x128xf32> to vector<8x32xf32>
    %167 = vector.extract_strided_slice %162 {offsets = [0, 96], sizes = [8, 32], strides = [1, 1]} : vector<8x128xf32> to vector<8x32xf32>
    %168 = arith.mulf %165, %132 : vector<8x32xf32>
    %169 = arith.mulf %164, %166 : vector<8x32xf32>
    %170 = arith.addf %168, %169 : vector<8x32xf32>
    %171 = math.tanh %170 : vector<8x32xf32>
    %172 = arith.mulf %167, %171 : vector<8x32xf32>
    %173 = tpu.concatenate %172, %153 in 1 : vector<8x32xf32>, vector<8x32xf32> -> vector<8x64xf32>
    %174 = arith.truncf %173 : vector<8x64xf32> to vector<8x64xbf16>
    %cst_28 = arith.constant dense<0.000000e+00> : vector<8x128xf32>
    %175 = tpu.matmul %174, %7, %cst_28 {dimension_numbers = #tpu.dot_dimension_numbers<[1], [0], [0], [1], [0, 0, 1, 1], [], []>} : vector<8x64xbf16>, vector<64x128xbf16>, vector<8x128xf32> -> vector<8x128xf32>
    %176 = arith.addf %175, %10 : vector<8x128xf32>
    %177 = arith.negf %176 : vector<8x128xf32>
    %178 = math.exp %177 : vector<8x128xf32>
    %cst_29 = arith.constant 1.000000e+00 : f32
    %179 = vector.broadcast %cst_29 : f32 to vector<8x128xf32>
    %180 = arith.addf %179, %178 : vector<8x128xf32>
    %181 = arith.divf %179, %180 : vector<8x128xf32>
    %182 = math.tanh %176 : vector<8x128xf32>
    %183 = vector.extract_strided_slice %181 {offsets = [0, 0], sizes = [8, 32], strides = [1, 1]} : vector<8x128xf32> to vector<8x32xf32>
    %184 = vector.extract_strided_slice %181 {offsets = [0, 32], sizes = [8, 32], strides = [1, 1]} : vector<8x128xf32> to vector<8x32xf32>
    %185 = vector.extract_strided_slice %182 {offsets = [0, 64], sizes = [8, 32], strides = [1, 1]} : vector<8x128xf32> to vector<8x32xf32>
    %186 = vector.extract_strided_slice %181 {offsets = [0, 96], sizes = [8, 32], strides = [1, 1]} : vector<8x128xf32> to vector<8x32xf32>
    %187 = arith.mulf %184, %151 : vector<8x32xf32>
    %188 = arith.mulf %183, %185 : vector<8x32xf32>
    %189 = arith.addf %187, %188 : vector<8x32xf32>
    %190 = math.tanh %189 : vector<8x32xf32>
    %191 = arith.mulf %186, %190 : vector<8x32xf32>
    %192 = vector.extract_strided_slice %5 {offsets = [40, 0], sizes = [8, 128], strides = [1, 1]} : vector<64x128xf32> to vector<8x128xf32>
    %193 = arith.truncf %172 : vector<8x32xf32> to vector<8x32xbf16>
    %cst_30 = arith.constant dense<0.000000e+00> : vector<8x128xf32>
    %194 = tpu.matmul %193, %6, %cst_30 {dimension_numbers = #tpu.dot_dimension_numbers<[1], [0], [0], [1], [0, 0, 1, 1], [], []>} : vector<8x32xbf16>, vector<32x128xbf16>, vector<8x128xf32> -> vector<8x128xf32>
    %195 = arith.addf %192, %194 : vector<8x128xf32>
    %196 = arith.negf %195 : vector<8x128xf32>
    %197 = math.exp %196 : vector<8x128xf32>
    %cst_31 = arith.constant 1.000000e+00 : f32
    %198 = vector.broadcast %cst_31 : f32 to vector<8x128xf32>
    %199 = arith.addf %198, %197 : vector<8x128xf32>
    %200 = arith.divf %198, %199 : vector<8x128xf32>
    %201 = math.tanh %195 : vector<8x128xf32>
    %202 = vector.extract_strided_slice %200 {offsets = [0, 0], sizes = [8, 32], strides = [1, 1]} : vector<8x128xf32> to vector<8x32xf32>
    %203 = vector.extract_strided_slice %200 {offsets = [0, 32], sizes = [8, 32], strides = [1, 1]} : vector<8x128xf32> to vector<8x32xf32>
    %204 = vector.extract_strided_slice %201 {offsets = [0, 64], sizes = [8, 32], strides = [1, 1]} : vector<8x128xf32> to vector<8x32xf32>
    %205 = vector.extract_strided_slice %200 {offsets = [0, 96], sizes = [8, 32], strides = [1, 1]} : vector<8x128xf32> to vector<8x32xf32>
    %206 = arith.mulf %203, %170 : vector<8x32xf32>
    %207 = arith.mulf %202, %204 : vector<8x32xf32>
    %208 = arith.addf %206, %207 : vector<8x32xf32>
    %209 = math.tanh %208 : vector<8x32xf32>
    %210 = arith.mulf %205, %209 : vector<8x32xf32>
    %211 = tpu.concatenate %210, %191 in 1 : vector<8x32xf32>, vector<8x32xf32> -> vector<8x64xf32>
    %212 = arith.truncf %211 : vector<8x64xf32> to vector<8x64xbf16>
    %cst_32 = arith.constant dense<0.000000e+00> : vector<8x128xf32>
    %213 = tpu.matmul %212, %7, %cst_32 {dimension_numbers = #tpu.dot_dimension_numbers<[1], [0], [0], [1], [0, 0, 1, 1], [], []>} : vector<8x64xbf16>, vector<64x128xbf16>, vector<8x128xf32> -> vector<8x128xf32>
    %214 = arith.addf %213, %10 : vector<8x128xf32>
    %215 = arith.negf %214 : vector<8x128xf32>
    %216 = math.exp %215 : vector<8x128xf32>
    %cst_33 = arith.constant 1.000000e+00 : f32
    %217 = vector.broadcast %cst_33 : f32 to vector<8x128xf32>
    %218 = arith.addf %217, %216 : vector<8x128xf32>
    %219 = arith.divf %217, %218 : vector<8x128xf32>
    %220 = math.tanh %214 : vector<8x128xf32>
    %221 = vector.extract_strided_slice %219 {offsets = [0, 0], sizes = [8, 32], strides = [1, 1]} : vector<8x128xf32> to vector<8x32xf32>
    %222 = vector.extract_strided_slice %219 {offsets = [0, 32], sizes = [8, 32], strides = [1, 1]} : vector<8x128xf32> to vector<8x32xf32>
    %223 = vector.extract_strided_slice %220 {offsets = [0, 64], sizes = [8, 32], strides = [1, 1]} : vector<8x128xf32> to vector<8x32xf32>
    %224 = vector.extract_strided_slice %219 {offsets = [0, 96], sizes = [8, 32], strides = [1, 1]} : vector<8x128xf32> to vector<8x32xf32>
    %225 = arith.mulf %222, %189 : vector<8x32xf32>
    %226 = arith.mulf %221, %223 : vector<8x32xf32>
    %227 = arith.addf %225, %226 : vector<8x32xf32>
    %228 = math.tanh %227 : vector<8x32xf32>
    %229 = arith.mulf %224, %228 : vector<8x32xf32>
    %230 = vector.extract_strided_slice %5 {offsets = [48, 0], sizes = [8, 128], strides = [1, 1]} : vector<64x128xf32> to vector<8x128xf32>
    %231 = arith.truncf %210 : vector<8x32xf32> to vector<8x32xbf16>
    %cst_34 = arith.constant dense<0.000000e+00> : vector<8x128xf32>
    %232 = tpu.matmul %231, %6, %cst_34 {dimension_numbers = #tpu.dot_dimension_numbers<[1], [0], [0], [1], [0, 0, 1, 1], [], []>} : vector<8x32xbf16>, vector<32x128xbf16>, vector<8x128xf32> -> vector<8x128xf32>
    %233 = arith.addf %230, %232 : vector<8x128xf32>
    %234 = arith.negf %233 : vector<8x128xf32>
    %235 = math.exp %234 : vector<8x128xf32>
    %cst_35 = arith.constant 1.000000e+00 : f32
    %236 = vector.broadcast %cst_35 : f32 to vector<8x128xf32>
    %237 = arith.addf %236, %235 : vector<8x128xf32>
    %238 = arith.divf %236, %237 : vector<8x128xf32>
    %239 = math.tanh %233 : vector<8x128xf32>
    %240 = vector.extract_strided_slice %238 {offsets = [0, 0], sizes = [8, 32], strides = [1, 1]} : vector<8x128xf32> to vector<8x32xf32>
    %241 = vector.extract_strided_slice %238 {offsets = [0, 32], sizes = [8, 32], strides = [1, 1]} : vector<8x128xf32> to vector<8x32xf32>
    %242 = vector.extract_strided_slice %239 {offsets = [0, 64], sizes = [8, 32], strides = [1, 1]} : vector<8x128xf32> to vector<8x32xf32>
    %243 = vector.extract_strided_slice %238 {offsets = [0, 96], sizes = [8, 32], strides = [1, 1]} : vector<8x128xf32> to vector<8x32xf32>
    %244 = arith.mulf %241, %208 : vector<8x32xf32>
    %245 = arith.mulf %240, %242 : vector<8x32xf32>
    %246 = arith.addf %244, %245 : vector<8x32xf32>
    %247 = math.tanh %246 : vector<8x32xf32>
    %248 = arith.mulf %243, %247 : vector<8x32xf32>
    %249 = tpu.concatenate %248, %229 in 1 : vector<8x32xf32>, vector<8x32xf32> -> vector<8x64xf32>
    %250 = arith.truncf %249 : vector<8x64xf32> to vector<8x64xbf16>
    %cst_36 = arith.constant dense<0.000000e+00> : vector<8x128xf32>
    %251 = tpu.matmul %250, %7, %cst_36 {dimension_numbers = #tpu.dot_dimension_numbers<[1], [0], [0], [1], [0, 0, 1, 1], [], []>} : vector<8x64xbf16>, vector<64x128xbf16>, vector<8x128xf32> -> vector<8x128xf32>
    %252 = arith.addf %251, %10 : vector<8x128xf32>
    %253 = arith.negf %252 : vector<8x128xf32>
    %254 = math.exp %253 : vector<8x128xf32>
    %cst_37 = arith.constant 1.000000e+00 : f32
    %255 = vector.broadcast %cst_37 : f32 to vector<8x128xf32>
    %256 = arith.addf %255, %254 : vector<8x128xf32>
    %257 = arith.divf %255, %256 : vector<8x128xf32>
    %258 = math.tanh %252 : vector<8x128xf32>
    %259 = vector.extract_strided_slice %257 {offsets = [0, 0], sizes = [8, 32], strides = [1, 1]} : vector<8x128xf32> to vector<8x32xf32>
    %260 = vector.extract_strided_slice %257 {offsets = [0, 32], sizes = [8, 32], strides = [1, 1]} : vector<8x128xf32> to vector<8x32xf32>
    %261 = vector.extract_strided_slice %258 {offsets = [0, 64], sizes = [8, 32], strides = [1, 1]} : vector<8x128xf32> to vector<8x32xf32>
    %262 = vector.extract_strided_slice %257 {offsets = [0, 96], sizes = [8, 32], strides = [1, 1]} : vector<8x128xf32> to vector<8x32xf32>
    %263 = arith.mulf %260, %227 : vector<8x32xf32>
    %264 = arith.mulf %259, %261 : vector<8x32xf32>
    %265 = arith.addf %263, %264 : vector<8x32xf32>
    %266 = math.tanh %265 : vector<8x32xf32>
    %267 = arith.mulf %262, %266 : vector<8x32xf32>
    %268 = vector.extract_strided_slice %5 {offsets = [56, 0], sizes = [8, 128], strides = [1, 1]} : vector<64x128xf32> to vector<8x128xf32>
    %269 = arith.truncf %248 : vector<8x32xf32> to vector<8x32xbf16>
    %cst_38 = arith.constant dense<0.000000e+00> : vector<8x128xf32>
    %270 = tpu.matmul %269, %6, %cst_38 {dimension_numbers = #tpu.dot_dimension_numbers<[1], [0], [0], [1], [0, 0, 1, 1], [], []>} : vector<8x32xbf16>, vector<32x128xbf16>, vector<8x128xf32> -> vector<8x128xf32>
    %271 = arith.addf %268, %270 : vector<8x128xf32>
    %272 = arith.negf %271 : vector<8x128xf32>
    %273 = math.exp %272 : vector<8x128xf32>
    %cst_39 = arith.constant 1.000000e+00 : f32
    %274 = vector.broadcast %cst_39 : f32 to vector<8x128xf32>
    %275 = arith.addf %274, %273 : vector<8x128xf32>
    %276 = arith.divf %274, %275 : vector<8x128xf32>
    %277 = math.tanh %271 : vector<8x128xf32>
    %278 = vector.extract_strided_slice %276 {offsets = [0, 0], sizes = [8, 32], strides = [1, 1]} : vector<8x128xf32> to vector<8x32xf32>
    %279 = vector.extract_strided_slice %276 {offsets = [0, 32], sizes = [8, 32], strides = [1, 1]} : vector<8x128xf32> to vector<8x32xf32>
    %280 = vector.extract_strided_slice %277 {offsets = [0, 64], sizes = [8, 32], strides = [1, 1]} : vector<8x128xf32> to vector<8x32xf32>
    %281 = vector.extract_strided_slice %276 {offsets = [0, 96], sizes = [8, 32], strides = [1, 1]} : vector<8x128xf32> to vector<8x32xf32>
    %282 = arith.mulf %279, %246 : vector<8x32xf32>
    %283 = arith.mulf %278, %280 : vector<8x32xf32>
    %284 = arith.addf %282, %283 : vector<8x32xf32>
    %285 = math.tanh %284 : vector<8x32xf32>
    %286 = arith.mulf %281, %285 : vector<8x32xf32>
    %287 = tpu.concatenate %286, %267 in 1 : vector<8x32xf32>, vector<8x32xf32> -> vector<8x64xf32>
    %288 = arith.truncf %287 : vector<8x64xf32> to vector<8x64xbf16>
    %cst_40 = arith.constant dense<0.000000e+00> : vector<8x128xf32>
    %289 = tpu.matmul %288, %7, %cst_40 {dimension_numbers = #tpu.dot_dimension_numbers<[1], [0], [0], [1], [0, 0, 1, 1], [], []>} : vector<8x64xbf16>, vector<64x128xbf16>, vector<8x128xf32> -> vector<8x128xf32>
    %290 = arith.addf %289, %10 : vector<8x128xf32>
    %291 = arith.negf %290 : vector<8x128xf32>
    %292 = math.exp %291 : vector<8x128xf32>
    %cst_41 = arith.constant 1.000000e+00 : f32
    %293 = vector.broadcast %cst_41 : f32 to vector<8x128xf32>
    %294 = arith.addf %293, %292 : vector<8x128xf32>
    %295 = arith.divf %293, %294 : vector<8x128xf32>
    %296 = math.tanh %290 : vector<8x128xf32>
    %297 = vector.extract_strided_slice %295 {offsets = [0, 0], sizes = [8, 32], strides = [1, 1]} : vector<8x128xf32> to vector<8x32xf32>
    %298 = vector.extract_strided_slice %295 {offsets = [0, 32], sizes = [8, 32], strides = [1, 1]} : vector<8x128xf32> to vector<8x32xf32>
    %299 = vector.extract_strided_slice %296 {offsets = [0, 64], sizes = [8, 32], strides = [1, 1]} : vector<8x128xf32> to vector<8x32xf32>
    %300 = vector.extract_strided_slice %295 {offsets = [0, 96], sizes = [8, 32], strides = [1, 1]} : vector<8x128xf32> to vector<8x32xf32>
    %301 = arith.mulf %298, %265 : vector<8x32xf32>
    %302 = arith.mulf %297, %299 : vector<8x32xf32>
    %303 = arith.addf %301, %302 : vector<8x32xf32>
    %304 = math.tanh %303 : vector<8x32xf32>
    %305 = arith.mulf %300, %304 : vector<8x32xf32>
    %c0_42 = arith.constant 0 : index
    %c0_43 = arith.constant 0 : index
    %306 = vector.load %arg6[%c0_42, %c0_43] : memref<1x32xf32, #tpu.memory_space<vmem>>, vector<1x32xf32>
    %307 = vector.broadcast %306 : vector<1x32xf32> to vector<8x32xf32>
    %308 = arith.mulf %305, %307 : vector<8x32xf32>
    %cst_44 = arith.constant dense<0.000000e+00> : vector<8xf32>
    %309 = vector.multi_reduction <add>, %308, %cst_44 [1] : vector<8x32xf32> to vector<8xf32>
    %310 = vector.shape_cast %309 : vector<8xf32> to vector<8x1xf32>
    %c0_45 = arith.constant 0 : index
    %c0_46 = arith.constant 0 : index
    %311 = vector.load %arg7[%c0_45, %c0_46] : memref<1x1xf32, #tpu.memory_space<vmem>>, vector<1x1xf32>
    %312 = vector.broadcast %311 : vector<1x1xf32> to vector<8x1xf32>
    %313 = arith.addf %310, %312 : vector<8x1xf32>
    %c0_47 = arith.constant 0 : index
    %c0_48 = arith.constant 0 : index
    %314 = vector.load %arg8[%c0_47, %c0_48] : memref<8x1xf32, #tpu.memory_space<vmem>>, vector<8x1xf32>
    tpu.vector_store %arg8[%c0_47, %c0_48], %313 {strides = array<i32>} : memref<8x1xf32, #tpu.memory_space<vmem>>, vector<8x1xf32>,
    return
  }
}

</mosaic_0001>

<bundles_post_ra>
// kernel: tpu_custom_call.1
= control target key start
LH: loop header
LB: loop body
LE: loop exit
PB: predicated region body
PF: predicated region fallthrough
CT: control target
= control target key end

     0   :  { %vm75_vm0 = vcmask 130048   ;;  %v1787_v16 = vmov 0.0   ;;  %vm1788_vm1 = vmmov 0   ;;  %s1789_s17 = smov 96   ;;  %s1790_s18 = smov 32   ;;  %vm206_vm2 = vcmask 261120   ;;  %s2202_s1 = inlined_call_operand.vmem [shape: bf16[16,128], index: 1, kind: input, shape index: {}]   ;;  %s2203_s0 = inlined_call_operand.vmem [shape: bf16[64,16], index: 0, kind: input, shape index: {}]   ;;  %s2204_s3 = inlined_call_operand.vmem [shape: f32[1,128], index: 3, kind: input, shape index: {}]   ;;  %s2205_s4 = inlined_call_operand.vmem [shape: bf16[64,128], index: 4, kind: input, shape index: {}]   ;;  %s2206_s2 = inlined_call_operand.vmem [shape: bf16[32,128], index: 2, kind: input, shape index: {}]   ;;  %s2207_s5 = inlined_call_operand.vmem [shape: f32[1,128], index: 5, kind: input, shape index: {}]   ;;  %s2208_s6 = inlined_call_operand.vmem [shape: f32[1,32], index: 6, kind: input, shape index: {}]   ;;  %s2209_s7 = inlined_call_operand.<no memory space> [shape: f32[1,1], index: 7, kind: input, shape index: {}]   ;;  %s2210_s8 = inlined_call_operand.vmem [shape: f32[8,1], index: 8, kind: output, shape index: {}]  }
   0x1   :  { %v1645_v0 = vld [vmem:[%s2202_s1] sm:$0xff]   ;;  %v1647_v2 = vld [vmem:[%s2203_s0 + $0x8] sm:$0xff]   ;;  %s1786_s1 = smov 64   ;;  %1492 = vmatprep.subr.bf16.mxu1 %v1787_v16  ;;  %1496 = vmatprep.mubr.msk.bf16.mxu1 %vm1788_vm1, %v1787_v16  ;;  %v1652_v57 = vld [vmem:[%s2203_s0 + $0x10] sm:$0xff]   ;;  %vm371_vm3 = vcmask 523264   ;;  %vm1362_vm4 = vcmask 7168  }
   0x2   :  { %v1646_v1 = vld [vmem:[%s2203_s0] sm:$0xff]   ;;  %1482 = vmatprep.subr.bf16.mxu0 %v1645_v0  ;;  %v1869_v18 = vld [vmem:[%s2205_s4 + $0x8] sm:$0xff]   ;;  %v1653_v58 = vld [vmem:[%s2203_s0 + $0x18] sm:$0xff]  }
   0x3   :  { %1483 = vmatpush3.bf16.msra.mxu0 %v1645_v0  ;;  %1484 = vmatprep.mubr.msk.bf16.mxu0 %vm75_vm0, %v1646_v1  ;;  %v1850_v3 = vld [vmem:[%s2204_s3] ss:$0 sm:$0xff]  ;;  %v1893_v25 = vld [vmem:[%s2206_s2 + $0x8] sm:$0xff]   ;;  %v1933_v59 = vld [vmem:[%s2205_s4 + $0x10] sm:$0xff]  }
   0x4   :  { %v1862_v17 = vld [vmem:[%s2205_s4] sm:$0xff]   ;;  %1508 = vmatprep.subr.bf16.mxu0 %v1787_v16  ;;  %v1940_v60 = vld [vmem:[%s2205_s4 + $0x18] sm:$0xff]  }
   0x5   :  { %1493 = vmatpush3.bf16.msra.mxu1 %v1862_v17  ;;  %v1886_v23 = vld [vmem:[%s2206_s2] sm:$0xff]  }
   0x6   :  { %1485 = vmatmul.mubr.msk.bf16.vlgmr.msra.gmra.mrb[0].mxu0 %vm75_vm0, %v1647_v2  ;;  %1494 = vmatprep.subr.bf16.mxu1 %v1787_v16  ;;  %v1911_v31 = vld [vmem:[%s2207_s5] ss:$0 sm:$0xff] }
   0x7   :  { %1509 = vmatpush3.bf16.msra.mxu0 %v1862_v17  ;;  %1488 = vmatprep.mubr.msk.bf16.mxu0 %vm75_vm0, %v1652_v57 }
   0x8   :  { %1510 = vmatprep.subr.bf16.mxu0 %v1787_v16 }
   0x9   :  { %1495 = vmatpush3.bf16.msra.mxu1 %v1869_v18 }
   0xa   :  { %1500 = vmatprep.subr.bf16.mxu1 %v1787_v16 }
   0xb   :  { %1511 = vmatpush3.bf16.msra.mxu0 %v1869_v18 }
   0xc   :  { %1512 = vmatprep.subr.bf16.mxu0 %v1787_v16 }
   0xe   :  { %1489 = vmatmul.mubr.msk.bf16.gmra.mrb[4].mxu0 %vm75_vm0, %v1653_v58 }
   0xf   :  { %1513 = vmatpush3.bf16.msra.mxu0 %v1933_v59  ;;  %1516 = vmatprep.mubr.msk.bf16.mxu0 %vm1788_vm1, %v1787_v16 }
  0x10   :  { %1514 = vmatprep.subr.bf16.mxu0 %v1787_v16 }
  0x13   :  { %1515 = vmatpush3.bf16.msra.mxu0 %v1940_v60 }
  0x14   :  { %1520 = vmatprep.subr.bf16.mxu0 %v1787_v16 }
  0xd9   :  { %v1852_v4 = vpop.f32.mrb[0].mxu0 }
  0xda   :  { %v122_v5 = vpop.f32.mrb[1].mxu0 }
  0xdb   :  { %v123_v6 = vadd.f32 %v1850_v3, %v122_v5  ;;  %v1855_v7 = vpop.f32.mrb[2].mxu0 }
  0xdc   :  { %v125_v8 = vpop.f32.mrb[3].mxu0 }
  0xdd   :  { %1656 = vtanh.f32 %v123_v6  ;;  %v1379_v10 = vmul.f32 -1.442695, %v123_v6  ;;  %v126_v30 = vadd.f32 %v1850_v3, %v125_v8 }
  0xdf   :  { %1658 = vpow2.f32 %v1379_v10 }
  0xe1   :  { %v1952_v5 = vpop.f32.mrb[4].mxu0 }
  0xe2   :  { %v1954_v6 = vpop.f32.mrb[5].mxu0 }
  0xe3   :  { %v1956_v8 = vpop.f32.mrb[6].mxu0 }
  0xe7   :  { %v1657_v9 = vpop.eup %1656 }
  0xe8   :  { %180 = vrot.lane.b32.xlu0 %v1657_v9, %s1786_s1  ;;  %v1958_v9 = vpop.f32.mrb[7].mxu0 }
  0xe9   :  { %v1659_v11 = vpop.eup %1658 }
  0xea   :  { %v175_v12 = vadd.f32 1.0, %v1659_v11 }
  0xec   :  { %1660 = vrcp.f32 %v175_v12 }
  0xf6   :  { %v1661_v13 = vpop.eup %1660 }
 0x15a   :  { %v181_v14 = vpop.permute.xlu0 %180 }
 0x15b   :  { %v183_v15 = vmul.f32 %v1661_v13, %v181_v14 }
 0x15d   :  { %1662 = vtanh.f32 %v183_v15 }
 0x167   :  { %v1663_v19 = vpop.eup %1662 }
 0x168   :  { %186 = vrot.lane.b32.xlu0 %v1663_v19, %s1789_s17 }
 0x16c   :  { %329 = vrot.lane.b32.xlu0 %v183_v15, %s1790_s18 }
 0x1da   :  { %v187_v20 = vpop.permute.xlu0 %186 }
 0x1db   :  { %v189_v21 = vmul.f32 %v1661_v13, %v187_v20 }
 0x1dd   :  { %v190_v22 = vpack.c.bf16 %v189_v21, %v189_v21 }
 0x1de   :  { %v330_v53 = vpop.permute.xlu0 %329 }
 0x1df   :  { %192 = vrot.lane.b32.xlu1 %v190_v22, %s1790_s18 }
 0x251   :  { %v193_v24 = vpop.permute.xlu1 %192 }
 0x252   :  { %1497 = vmatmul.mubr.msk.bf16.vlgmr.msra.gmra.mrb[0].mxu1 %vm206_vm2, %v193_v24 }
 0x253   :  { %1501 = vmatpush3.bf16.msra.mxu1 %v1886_v23  ;;  %1504 = vmatprep.mubr.msk.bf16.mxu1 %vm1788_vm1, %v1787_v16 }
 0x254   :  { %1502 = vmatprep.subr.bf16.mxu1 %v1787_v16 }
 0x257   :  { %1503 = vmatpush3.bf16.msra.mxu1 %v1893_v25 }
 0x258   :  { %1540 = vmatprep.subr.bf16.mxu1 %v1787_v16 }
 0x25a   :  { %1505 = vmatmul.mubr.msk.bf16.vlgmr.msra.gmra.mrb[4].mxu1 %vm206_vm2, %v193_v24  ;;  %v131_v24 = vadd.f32 %v1852_v4, %v1850_v3 }
 0x25b   :  { %1541 = vmatpush3.bf16.msra.mxu1 %v1886_v23  ;;  %1544 = vmatprep.mubr.msk.bf16.mxu1 %vm1788_vm1, %v1787_v16 }
 0x25c   :  { %1542 = vmatprep.subr.bf16.mxu1 %v1787_v16 }
 0x25f   :  { %1543 = vmatpush3.bf16.msra.mxu1 %v1893_v25 }
 0x260   :  { %1548 = vmatprep.subr.bf16.mxu1 %v1787_v16 }
 0x325   :  { %v244_v26 = vpop.f32.mrb[0].mxu1 }
 0x326   :  { %v1498_v27 = vpop.f32.mrb[1].mxu1  ;;  %v245_v36 = vadd.f32 %v1911_v31, %v244_v26 }
 0x327   :  { %v247_v28 = vpop.f32.mrb[2].mxu1 }
 0x328   :  { %v1499_v29 = vpop.f32.mrb[3].mxu1  ;;  %v1383_v41 = vmul.f32 -1.442695, %v245_v36 }
 0x32d   :  { %v314_v32 = vpop.f32.mrb[4].mxu1 }
 0x32e   :  { %v320_v33 = vadd.f32 %v314_v32, %v126_v30  ;;  %v1506_v34 = vpop.f32.mrb[5].mxu1 }
 0x32f   :  { %v317_v35 = vpop.f32.mrb[6].mxu1 }
 0x330   :  { %1664 = vtanh.f32 %v320_v33  ;;  %v1507_v37 = vpop.f32.mrb[7].mxu1  ;;  %v1387_v40 = vmul.f32 -1.442695, %v320_v33 }
 0x331   :  { %1666 = vtanh.f32 %v245_v36 }
 0x332   :  { %1668 = vpow2.f32 %v1387_v40 }
 0x333   :  { %1670 = vpow2.f32 %v1383_v41 }
 0x33a   :  { %v1665_v38 = vpop.eup %1664 }
 0x33b   :  { %334 = vrot.lane.b32.xlu1 %v1665_v38, %s1786_s1  ;;  %v1667_v39 = vpop.eup %1666 }
 0x33c   :  { %v1669_v42 = vpop.eup %1668 }
 0x33d   :  { %v324_v43 = vadd.f32 1.0, %v1669_v42  ;;  %v1671_v44 = vpop.eup %1670 }
 0x33e   :  { %v253_v45 = vadd.f32 1.0, %v1671_v44 }
 0x33f   :  { %258 = vrot.lane.b32.xlu1 %v1667_v39, %s1786_s1  ;;  %1672 = vrcp.f32 %v324_v43 }
 0x340   :  { %1674 = vrcp.f32 %v253_v45 }
 0x349   :  { %v1673_v46 = vpop.eup %1672 }
 0x34a   :  { %v1675_v49 = vpop.eup %1674  ;;  %v332_v54 = vmul.f32 %v1673_v46, %v330_v53 }
 0x3ad   :  { %v335_v47 = vpop.permute.xlu1 %334 }
 0x3ae   :  { %v337_v48 = vmul.f32 %v1673_v46, %v335_v47 }
 0x3b0   :  { %339 = vrot.lane.b32.xlu0 %v337_v48, %s1790_s18 }
 0x3b1   :  { %v259_v50 = vpop.permute.xlu1 %258 }
 0x3b2   :  { %v1917_v51 = vmul.f32 %v1675_v49, %v259_v50 }
 0x3b4   :  { %1676 = vtanh.f32 %v1917_v51 }
 0x3be   :  { %v1677_v52 = vpop.eup %1676 }
 0x3bf   :  { %264 = vrot.lane.b32.xlu1 %v1677_v52, %s1789_s17 }
 0x422   :  { %v340_v55 = vpop.permute.xlu0 %339 }
 0x423   :  { %v1921_v56 = vadd.f32 %v340_v55, %v332_v54 }
 0x425   :  { %1678 = vtanh.f32 %v1921_v56 }
 0x42f   :  { %v1679_v61 = vpop.eup %1678 }
 0x430   :  { %345 = vrot.lane.b32.xlu0 %v1679_v61, %s1786_s1 }
 0x431   :  { %v265_v62 = vpop.permute.xlu1 %264 }
 0x432   :  { %v267_v63 = vmul.f32 %v1675_v49, %v265_v62 }
 0x434   :  { %354 = vrot.lane.b32.xlu0 %v267_v63, %s1786_s1 }
 0x4a2   :  { %v346_v0 = vpop.permute.xlu0 %345 }
 0x4a3   :  { %v348_v1 = vmul.f32 %v1673_v46, %v346_v0 }
 0x4a5   :  { %350 = vrot.lane.b32.xlu1 %v348_v1, %s1790_s18  ;;  %v443_v2 = vpack.c.bf16 %v348_v1, %v348_v1 }
 0x4a6   :  { %v355_v10 = vpop.permute.xlu0 %354 }
 0x4a9   :  { %445 = vrot.lane.b32.xlu1 %v443_v2, %s1790_s18  ;;  %v134_v2 = vadd.f32 %v1855_v7, %v1850_v3 }
 0x517   :  { %v351_v11 = vpop.permute.xlu1 %350 }
 0x518   :  { %v357_v12 = vsel %vm206_vm2, %v351_v11, %v355_v10 }
 0x519   :  { %v358_v13 = vpack.c.bf16 %v357_v12, %v357_v12 }
 0x51b   :  { %1517 = vmatmul.mubr.msk.bf16.vlgmr.msra.gmra.mrb[8].mxu0 %vm371_vm3, %v358_v13  ;;  %v446_v14 = vpop.permute.xlu1 %445 }
 0x51c   :  { %1521 = vmatpush3.bf16.msra.mxu0 %v1886_v23  ;;  %1524 = vmatprep.mubr.msk.bf16.mxu0 %vm1788_vm1, %v1787_v16 }
 0x51d   :  { %1522 = vmatprep.subr.bf16.mxu0 %v1787_v16 }
 0x520   :  { %1523 = vmatpush3.bf16.msra.mxu0 %v1893_v25 }
 0x521   :  { %1528 = vmatprep.subr.bf16.mxu0 %v1787_v16 }
 0x523   :  { %1525 = vmatmul.mubr.msk.bf16.vlgmr.msra.gmra.mrb[12].mxu0 %vm206_vm2, %v446_v14 }
 0x524   :  { %1529 = vmatpush3.bf16.msra.mxu0 %v1862_v17  ;;  %1536 = vmatprep.mubr.msk.bf16.mxu0 %vm1788_vm1, %v1787_v16 }
 0x525   :  { %1530 = vmatprep.subr.bf16.mxu0 %v1787_v16 }
 0x528   :  { %1531 = vmatpush3.bf16.msra.mxu0 %v1869_v18 }
 0x529   :  { %1532 = vmatprep.subr.bf16.mxu0 %v1787_v16 }
 0x52c   :  { %1533 = vmatpush3.bf16.msra.mxu0 %v1933_v59 }
 0x52d   :  { %1534 = vmatprep.subr.bf16.mxu0 %v1787_v16 }
 0x530   :  { %1535 = vmatpush3.bf16.msra.mxu0 %v1940_v60 }
 0x531   :  { %1560 = vmatprep.subr.bf16.mxu0 %v1787_v16 }
 0x5ee   :  { %v409_v15 = vpop.f32.mrb[8].mxu0 }
 0x5ef   :  { %v410_v19 = vadd.f32 %v1911_v31, %v409_v15  ;;  %v1518_v20 = vpop.f32.mrb[9].mxu0 }
 0x5f0   :  { %v412_v21 = vpop.f32.mrb[10].mxu0 }
 0x5f1   :  { %1680 = vtanh.f32 %v410_v19  ;;  %v1519_v22 = vpop.f32.mrb[11].mxu0  ;;  %v1391_v34 = vmul.f32 -1.442695, %v410_v19 }
 0x5f6   :  { %v484_v26 = vpop.f32.mrb[12].mxu0 }
 0x5f7   :  { %v490_v27 = vadd.f32 %v484_v26, %v131_v24  ;;  %v1526_v28 = vpop.f32.mrb[13].mxu0 }
 0x5f8   :  { %v487_v29 = vpop.f32.mrb[14].mxu0 }
 0x5f9   :  { %1682 = vtanh.f32 %v490_v27  ;;  %v1527_v30 = vpop.f32.mrb[15].mxu0  ;;  %v1393_v35 = vmul.f32 -1.442695, %v490_v27 }
 0x5fa   :  { %1684 = vpow2.f32 %v1391_v34 }
 0x5fb   :  { %v1681_v32 = vpop.eup %1680  ;;  %1686 = vpow2.f32 %v1393_v35 }
 0x5fc   :  { %428 = vrot.lane.b32.xlu0 %v1681_v32, %s1786_s1 }
 0x600   :  { %423 = vrot.lane.b32.xlu0 %v1917_v51, %s1790_s18 }
 0x603   :  { %v1683_v33 = vpop.eup %1682 }
 0x604   :  { %500 = vrot.lane.b32.xlu1 %v1683_v33, %s1786_s1  ;;  %v1685_v4 = vpop.eup %1684 }
 0x605   :  { %v418_v36 = vadd.f32 1.0, %v1685_v4  ;;  %v1687_v37 = vpop.eup %1686 }
 0x606   :  { %v494_v38 = vadd.f32 1.0, %v1687_v37 }
 0x607   :  { %1688 = vrcp.f32 %v418_v36 }
 0x608   :  { %1690 = vrcp.f32 %v494_v38 }
 0x611   :  { %v1689_v39 = vpop.eup %1688 }
 0x612   :  { %v1691_v42 = vpop.eup %1690 }
 0x613   :  { %v498_v49 = vmul.f32 %v1691_v42, %v1921_v56 }
 0x66e   :  { %v429_v40 = vpop.permute.xlu0 %428 }
 0x66f   :  { %v431_v41 = vmul.f32 %v1689_v39, %v429_v40 }
 0x671   :  { %433 = vrot.lane.b32.xlu1 %v431_v41, %s1790_s18 }
 0x672   :  { %v424_v45 = vpop.permute.xlu0 %423 }
 0x673   :  { %v426_v46 = vmul.f32 %v1689_v39, %v424_v45 }
 0x676   :  { %v501_v43 = vpop.permute.xlu1 %500 }
 0x677   :  { %v503_v44 = vmul.f32 %v1691_v42, %v501_v43 }
 0x679   :  { %505 = vrot.lane.b32.xlu0 %v503_v44, %s1790_s18 }
 0x6e3   :  { %v434_v47 = vpop.permute.xlu1 %433 }
 0x6e4   :  { %v1988_v48 = vadd.f32 %v434_v47, %v426_v46 }
 0x6e6   :  { %1692 = vtanh.f32 %v1988_v48 }
 0x6eb   :  { %v506_v50 = vpop.permute.xlu0 %505 }
 0x6ec   :  { %v1992_v51 = vadd.f32 %v506_v50, %v498_v49 }
 0x6ee   :  { %1694 = vtanh.f32 %v1992_v51 }
 0x6f0   :  { %v1693_v52 = vpop.eup %1692 }
 0x6f1   :  { %439 = vrot.lane.b32.xlu1 %v1693_v52, %s1786_s1 }
 0x6f8   :  { %v1695_v53 = vpop.eup %1694 }
 0x6f9   :  { %511 = vrot.lane.b32.xlu0 %v1695_v53, %s1786_s1 }
 0x763   :  { %v440_v54 = vpop.permute.xlu1 %439 }
 0x764   :  { %v442_v55 = vmul.f32 %v1689_v39, %v440_v54 }
 0x766   :  { %520 = vrot.lane.b32.xlu0 %v442_v55, %s1786_s1 }
 0x76b   :  { %v512_v57 = vpop.permute.xlu0 %511 }
 0x76c   :  { %v514_v58 = vmul.f32 %v1691_v42, %v512_v57  ;;  %v139_v57 = vadd.f32 %v1850_v3, %v1954_v6 }
 0x76e   :  { %516 = vrot.lane.b32.xlu1 %v514_v58, %s1790_s18  ;;  %v592_v56 = vpack.c.bf16 %v514_v58, %v514_v58 }
 0x772   :  { %594 = vrot.lane.b32.xlu1 %v592_v56, %s1790_s18 }
 0x7d8   :  { %v521_v61 = vpop.permute.xlu0 %520 }
 0x7e0   :  { %v517_v62 = vpop.permute.xlu1 %516 }
 0x7e1   :  { %v523_v63 = vsel %vm206_vm2, %v517_v62, %v521_v61 }
 0x7e2   :  { %v524_v0 = vpack.c.bf16 %v523_v63, %v523_v63 }
 0x7e4   :  { %v595_v1 = vpop.permute.xlu1 %594  ;;  %1537 = vmatmul.mubr.msk.bf16.vlgmr.msra.gmra.mrb[16].mxu0 %vm371_vm3, %v524_v0 }
 0x7e5   :  { %1545 = vmatmul.mubr.msk.bf16.vlgmr.msra.gmra.mrb[8].mxu1 %vm206_vm2, %v595_v1  ;;  %1561 = vmatpush3.bf16.msra.mxu0 %v1886_v23 }
 0x7e6   :  { %1549 = vmatpush3.bf16.msra.mxu1 %v1862_v17  ;;  %1562 = vmatprep.subr.bf16.mxu0 %v1787_v16 }
 0x7e7   :  { %1550 = vmatprep.subr.bf16.mxu1 %v1787_v16  ;;  %1556 = vmatprep.mubr.msk.bf16.mxu1 %vm1788_vm1, %v1787_v16 }
 0x7e8   :  { %1564 = vmatprep.mubr.msk.bf16.mxu0 %vm1788_vm1, %v1787_v16 }
 0x7e9   :  { %1563 = vmatpush3.bf16.msra.mxu0 %v1893_v25 }
 0x7ea   :  { %1551 = vmatpush3.bf16.msra.mxu1 %v1869_v18  ;;  %1568 = vmatprep.subr.bf16.mxu0 %v1787_v16 }
 0x7eb   :  { %1552 = vmatprep.subr.bf16.mxu1 %v1787_v16 }
 0x7ee   :  { %1553 = vmatpush3.bf16.msra.mxu1 %v1933_v59 }
 0x7ef   :  { %1554 = vmatprep.subr.bf16.mxu1 %v1787_v16 }
 0x7f2   :  { %1555 = vmatpush3.bf16.msra.mxu1 %v1940_v60 }
 0x7f3   :  { %1580 = vmatprep.subr.bf16.mxu1 %v1787_v16 }
 0x8b7   :  { %v562_v10 = vpop.f32.mrb[16].mxu0 }
 0x8b8   :  { %v563_v11 = vadd.f32 %v1911_v31, %v562_v10  ;;  %v1538_v12 = vpop.f32.mrb[17].mxu0  ;;  %v633_v13 = vpop.f32.mrb[8].mxu1 }
 0x8b9   :  { %v639_v14 = vadd.f32 %v633_v13, %v134_v2  ;;  %v565_v15 = vpop.f32.mrb[18].mxu0  ;;  %v1546_v19 = vpop.f32.mrb[9].mxu1 }
 0x8ba   :  { %1696 = vtanh.f32 %v563_v11  ;;  %v1539_v20 = vpop.f32.mrb[19].mxu0  ;;  %v636_v21 = vpop.f32.mrb[10].mxu1  ;;  %v1395_v7 = vmul.f32 -1.442695, %v563_v11 }
 0x8bb   :  { %1698 = vtanh.f32 %v639_v14  ;;  %v1547_v22 = vpop.f32.mrb[11].mxu1  ;;  %v1397_v27 = vmul.f32 -1.442695, %v639_v14 }
 0x8bc   :  { %1700 = vpow2.f32 %v1395_v7 }
 0x8bd   :  { %1702 = vpow2.f32 %v1397_v27 }
 0x8c4   :  { %v1697_v24 = vpop.eup %1696 }
 0x8c5   :  { %v1699_v26 = vpop.eup %1698  ;;  %577 = vrot.lane.b32.xlu0 %v1697_v24, %s1786_s1 }
 0x8c6   :  { %649 = vrot.lane.b32.xlu1 %v1699_v26, %s1786_s1  ;;  %v1701_v28 = vpop.eup %1700 }
 0x8c7   :  { %v1703_v29 = vpop.eup %1702  ;;  %v571_v30 = vadd.f32 1.0, %v1701_v28 }
 0x8c8   :  { %v643_v32 = vadd.f32 1.0, %v1703_v29 }
 0x8c9   :  { %1704 = vrcp.f32 %v571_v30 }
 0x8ca   :  { %1706 = vrcp.f32 %v643_v32 }
 0x8d3   :  { %v1705_v33 = vpop.eup %1704 }
 0x8d4   :  { %v1707_v35 = vpop.eup %1706  ;;  %v575_v38 = vmul.f32 %v1705_v33, %v1988_v48 }
 0x8d5   :  { %v647_v40 = vmul.f32 %v1707_v35, %v1992_v51 }
 0x937   :  { %v578_v34 = vpop.permute.xlu0 %577 }
 0x938   :  { %v580_v4 = vmul.f32 %v1705_v33, %v578_v34  ;;  %v650_v36 = vpop.permute.xlu1 %649 }
 0x939   :  { %v652_v37 = vmul.f32 %v1707_v35, %v650_v36 }
 0x93a   :  { %582 = vrot.lane.b32.xlu0 %v580_v4, %s1790_s18 }
 0x93b   :  { %654 = vrot.lane.b32.xlu1 %v652_v37, %s1790_s18 }
 0x9ac   :  { %v583_v39 = vpop.permute.xlu0 %582 }
 0x9ad   :  { %v2028_v41 = vadd.f32 %v583_v39, %v575_v38  ;;  %v655_v42 = vpop.permute.xlu1 %654 }
 0x9ae   :  { %v2030_v43 = vadd.f32 %v655_v42, %v647_v40 }
 0x9af   :  { %1708 = vtanh.f32 %v2028_v41 }
 0x9b0   :  { %1710 = vtanh.f32 %v2030_v43 }
 0x9b9   :  { %v1709_v44 = vpop.eup %1708 }
 0x9ba   :  { %v1711_v45 = vpop.eup %1710  ;;  %588 = vrot.lane.b32.xlu0 %v1709_v44, %s1786_s1 }
 0x9bb   :  { %660 = vrot.lane.b32.xlu1 %v1711_v45, %s1786_s1 }
 0xa2c   :  { %v589_v46 = vpop.permute.xlu0 %588 }
 0xa2d   :  { %v591_v47 = vmul.f32 %v1705_v33, %v589_v46  ;;  %v661_v48 = vpop.permute.xlu1 %660 }
 0xa2e   :  { %v663_v49 = vmul.f32 %v1707_v35, %v661_v48 }
 0xa2f   :  { %669 = vrot.lane.b32.xlu1 %v591_v47, %s1786_s1  ;;  %v142_v47 = vadd.f32 %v1850_v3, %v1958_v9 }
 0xa30   :  { %665 = vrot.lane.b32.xlu0 %v663_v49, %s1790_s18  ;;  %v741_v50 = vpack.c.bf16 %v663_v49, %v663_v49 }
 0xa34   :  { %743 = vrot.lane.b32.xlu0 %v741_v50, %s1790_s18 }
 0xaa1   :  { %v670_v51 = vpop.permute.xlu1 %669 }
 0xaa2   :  { %v666_v52 = vpop.permute.xlu0 %665 }
 0xaa3   :  { %v672_v53 = vsel %vm206_vm2, %v666_v52, %v670_v51 }
 0xaa4   :  { %v673_v54 = vpack.c.bf16 %v672_v53, %v672_v53 }
 0xaa6   :  { %1557 = vmatmul.mubr.msk.bf16.vlgmr.msra.gmra.mrb[12].mxu1 %vm371_vm3, %v673_v54  ;;  %v744_v55 = vpop.permute.xlu0 %743 }
 0xaa7   :  { %1565 = vmatmul.mubr.msk.bf16.vlgmr.msra.gmra.mrb[20].mxu0 %vm206_vm2, %v744_v55  ;;  %1581 = vmatpush3.bf16.msra.mxu1 %v1886_v23 }
 0xaa8   :  { %1569 = vmatpush3.bf16.msra.mxu0 %v1862_v17  ;;  %1582 = vmatprep.subr.bf16.mxu1 %v1787_v16 }
 0xaa9   :  { %1570 = vmatprep.subr.bf16.mxu0 %v1787_v16  ;;  %1576 = vmatprep.mubr.msk.bf16.mxu0 %vm1788_vm1, %v1787_v16 }
 0xaaa   :  { %1584 = vmatprep.mubr.msk.bf16.mxu1 %vm1788_vm1, %v1787_v16 }
 0xaab   :  { %1583 = vmatpush3.bf16.msra.mxu1 %v1893_v25 }
 0xaac   :  { %1571 = vmatpush3.bf16.msra.mxu0 %v1869_v18  ;;  %1588 = vmatprep.subr.bf16.mxu1 %v1787_v16 }
 0xaad   :  { %1572 = vmatprep.subr.bf16.mxu0 %v1787_v16 }
 0xab0   :  { %1573 = vmatpush3.bf16.msra.mxu0 %v1933_v59 }
 0xab1   :  { %1574 = vmatprep.subr.bf16.mxu0 %v1787_v16 }
 0xab4   :  { %1575 = vmatpush3.bf16.msra.mxu0 %v1940_v60 }
 0xab5   :  { %1600 = vmatprep.subr.bf16.mxu0 %v1787_v16 }
 0xb79   :  { %v711_v58 = vpop.f32.mrb[12].mxu1 }
 0xb7a   :  { %v712_v56 = vadd.f32 %v1911_v31, %v711_v58  ;;  %v1558_v61 = vpop.f32.mrb[13].mxu1  ;;  %v782_v62 = vpop.f32.mrb[20].mxu0 }
 0xb7b   :  { %v788_v63 = vadd.f32 %v782_v62, %v139_v57  ;;  %v714_v0 = vpop.f32.mrb[14].mxu1  ;;  %v1566_v1 = vpop.f32.mrb[21].mxu0 }
 0xb7c   :  { %1712 = vtanh.f32 %v712_v56  ;;  %v1559_v2 = vpop.f32.mrb[15].mxu1  ;;  %v785_v10 = vpop.f32.mrb[22].mxu0  ;;  %v1399_v6 = vmul.f32 -1.442695, %v712_v56 }
 0xb7d   :  { %1714 = vtanh.f32 %v788_v63  ;;  %v1567_v11 = vpop.f32.mrb[23].mxu0  ;;  %v1401_v14 = vmul.f32 -1.442695, %v788_v63 }
 0xb7e   :  { %1716 = vpow2.f32 %v1399_v6 }
 0xb7f   :  { %1718 = vpow2.f32 %v1401_v14 }
 0xb86   :  { %v1713_v12 = vpop.eup %1712 }
 0xb87   :  { %v1715_v13 = vpop.eup %1714  ;;  %726 = vrot.lane.b32.xlu1 %v1713_v12, %s1786_s1 }
 0xb88   :  { %798 = vrot.lane.b32.xlu0 %v1715_v13, %s1786_s1  ;;  %v1717_v15 = vpop.eup %1716 }
 0xb89   :  { %v1719_v19 = vpop.eup %1718  ;;  %v720_v20 = vadd.f32 1.0, %v1717_v15 }
 0xb8a   :  { %v792_v21 = vadd.f32 1.0, %v1719_v19 }
 0xb8b   :  { %1720 = vrcp.f32 %v720_v20 }
 0xb8c   :  { %1722 = vrcp.f32 %v792_v21 }
 0xb95   :  { %v1721_v22 = vpop.eup %1720 }
 0xb96   :  { %v1723_v26 = vpop.eup %1722  ;;  %v724_v29 = vmul.f32 %v1721_v22, %v2028_v41 }
 0xb97   :  { %v796_v32 = vmul.f32 %v1723_v26, %v2030_v43 }
 0xbf9   :  { %v727_v24 = vpop.permute.xlu1 %726 }
 0xbfa   :  { %v729_v7 = vmul.f32 %v1721_v22, %v727_v24  ;;  %v799_v27 = vpop.permute.xlu0 %798 }
 0xbfb   :  { %v801_v28 = vmul.f32 %v1723_v26, %v799_v27 }
 0xbfc   :  { %731 = vrot.lane.b32.xlu1 %v729_v7, %s1790_s18 }
 0xbfd   :  { %803 = vrot.lane.b32.xlu0 %v801_v28, %s1790_s18 }
 0xc6e   :  { %v732_v30 = vpop.permute.xlu1 %731 }
 0xc6f   :  { %v2067_v33 = vadd.f32 %v732_v30, %v724_v29  ;;  %v804_v34 = vpop.permute.xlu0 %803 }
 0xc70   :  { %v2069_v35 = vadd.f32 %v804_v34, %v796_v32 }
 0xc71   :  { %1724 = vtanh.f32 %v2067_v33 }
 0xc72   :  { %1726 = vtanh.f32 %v2069_v35 }
 0xc7b   :  { %v1725_v4 = vpop.eup %1724 }
 0xc7c   :  { %v1727_v36 = vpop.eup %1726  ;;  %737 = vrot.lane.b32.xlu1 %v1725_v4, %s1786_s1 }
 0xc7d   :  { %809 = vrot.lane.b32.xlu0 %v1727_v36, %s1786_s1 }
 0xcee   :  { %v738_v37 = vpop.permute.xlu1 %737 }
 0xcef   :  { %v740_v38 = vmul.f32 %v1721_v22, %v738_v37  ;;  %v810_v39 = vpop.permute.xlu0 %809 }
 0xcf0   :  { %v812_v40 = vmul.f32 %v1723_v26, %v810_v39 }
 0xcf1   :  { %818 = vrot.lane.b32.xlu0 %v740_v38, %s1786_s1 }
 0xcf2   :  { %814 = vrot.lane.b32.xlu1 %v812_v40, %s1790_s18  ;;  %v890_v41 = vpack.c.bf16 %v812_v40, %v812_v40 }
 0xcf6   :  { %892 = vrot.lane.b32.xlu1 %v890_v41, %s1790_s18 }
 0xd63   :  { %v819_v42 = vpop.permute.xlu0 %818 }
 0xd64   :  { %v815_v43 = vpop.permute.xlu1 %814 }
 0xd65   :  { %v821_v44 = vsel %vm206_vm2, %v815_v43, %v819_v42 }
 0xd66   :  { %v822_v45 = vpack.c.bf16 %v821_v44, %v821_v44 }
 0xd68   :  { %v893_v46 = vpop.permute.xlu1 %892  ;;  %1577 = vmatmul.mubr.msk.bf16.vlgmr.msra.gmra.mrb[24].mxu0 %vm371_vm3, %v822_v45 }
 0xd69   :  { %1585 = vmatmul.mubr.msk.bf16.vlgmr.msra.gmra.mrb[16].mxu1 %vm206_vm2, %v893_v46  ;;  %1601 = vmatpush3.bf16.msra.mxu0 %v1886_v23 }
 0xd6a   :  { %1589 = vmatpush3.bf16.msra.mxu1 %v1862_v17  ;;  %1602 = vmatprep.subr.bf16.mxu0 %v1787_v16 }
 0xd6b   :  { %1590 = vmatprep.subr.bf16.mxu1 %v1787_v16  ;;  %1596 = vmatprep.mubr.msk.bf16.mxu1 %vm1788_vm1, %v1787_v16 }
 0xd6c   :  { %1604 = vmatprep.mubr.msk.bf16.mxu0 %vm1788_vm1, %v1787_v16 }
 0xd6d   :  { %1603 = vmatpush3.bf16.msra.mxu0 %v1893_v25 }
 0xd6e   :  { %1591 = vmatpush3.bf16.msra.mxu1 %v1869_v18  ;;  %1608 = vmatprep.subr.bf16.mxu0 %v1787_v16 }
 0xd6f   :  { %1592 = vmatprep.subr.bf16.mxu1 %v1787_v16 }
 0xd72   :  { %1593 = vmatpush3.bf16.msra.mxu1 %v1933_v59 }
 0xd73   :  { %1594 = vmatprep.subr.bf16.mxu1 %v1787_v16 }
 0xd76   :  { %1595 = vmatpush3.bf16.msra.mxu1 %v1940_v60 }
 0xd77   :  { %1620 = vmatprep.subr.bf16.mxu1 %v1787_v16 }
 0xe3b   :  { %v860_v48 = vpop.f32.mrb[24].mxu0 }
 0xe3c   :  { %v861_v49 = vadd.f32 %v1911_v31, %v860_v48  ;;  %v1578_v50 = vpop.f32.mrb[25].mxu0  ;;  %v931_v51 = vpop.f32.mrb[16].mxu1 }
 0xe3d   :  { %v937_v52 = vadd.f32 %v931_v51, %v142_v47  ;;  %v863_v53 = vpop.f32.mrb[26].mxu0  ;;  %v1586_v54 = vpop.f32.mrb[17].mxu1 }
 0xe3e   :  { %1728 = vtanh.f32 %v861_v49  ;;  %v1579_v55 = vpop.f32.mrb[27].mxu0  ;;  %v934_v57 = vpop.f32.mrb[18].mxu1  ;;  %v1403_v9 = vmul.f32 -1.442695, %v861_v49 }
 0xe3f   :  { %1730 = vtanh.f32 %v937_v52  ;;  %v1587_v58 = vpop.f32.mrb[19].mxu1  ;;  %v1405_v62 = vmul.f32 -1.442695, %v937_v52 }
 0xe40   :  { %1732 = vpow2.f32 %v1403_v9 }
 0xe41   :  { %1734 = vpow2.f32 %v1405_v62 }
 0xe48   :  { %v1729_v56 = vpop.eup %1728 }
 0xe49   :  { %v1731_v61 = vpop.eup %1730  ;;  %875 = vrot.lane.b32.xlu0 %v1729_v56, %s1786_s1 }
 0xe4a   :  { %947 = vrot.lane.b32.xlu1 %v1731_v61, %s1786_s1  ;;  %v1733_v63 = vpop.eup %1732 }
 0xe4b   :  { %v1735_v0 = vpop.eup %1734  ;;  %v869_v1 = vadd.f32 1.0, %v1733_v63 }
 0xe4c   :  { %v941_v2 = vadd.f32 1.0, %v1735_v0 }
 0xe4d   :  { %1736 = vrcp.f32 %v869_v1 }
 0xe4e   :  { %1738 = vrcp.f32 %v941_v2 }
 0xe57   :  { %v1737_v10 = vpop.eup %1736 }
 0xe58   :  { %v1739_v12 = vpop.eup %1738  ;;  %v873_v15 = vmul.f32 %v1737_v10, %v2067_v33 }
 0xe59   :  { %v945_v20 = vmul.f32 %v1739_v12, %v2069_v35 }
 0xebb   :  { %v876_v11 = vpop.permute.xlu0 %875 }
 0xebc   :  { %v878_v13 = vmul.f32 %v1737_v10, %v876_v11  ;;  %v948_v6 = vpop.permute.xlu1 %947 }
 0xebd   :  { %v950_v14 = vmul.f32 %v1739_v12, %v948_v6 }
 0xebe   :  { %880 = vrot.lane.b32.xlu0 %v878_v13, %s1790_s18 }
 0xebf   :  { %952 = vrot.lane.b32.xlu1 %v950_v14, %s1790_s18 }
 0xf30   :  { %v881_v19 = vpop.permute.xlu0 %880 }
 0xf31   :  { %v2106_v21 = vadd.f32 %v881_v19, %v873_v15  ;;  %v953_v22 = vpop.permute.xlu1 %952 }
 0xf32   :  { %v2108_v24 = vadd.f32 %v953_v22, %v945_v20  ;;  %v1784_v22 = vld [vmem:[%s2204_s3] ss:$0 sm:$0xff] }
 0xf33   :  { %1740 = vtanh.f32 %v2106_v21 }
 0xf34   :  { %1742 = vtanh.f32 %v2108_v24 }
 0xf3d   :  { %v1741_v26 = vpop.eup %1740 }
 0xf3e   :  { %v1743_v7 = vpop.eup %1742  ;;  %886 = vrot.lane.b32.xlu0 %v1741_v26, %s1786_s1 }
 0xf3f   :  { %958 = vrot.lane.b32.xlu1 %v1743_v7, %s1786_s1 }
 0xfb0   :  { %v887_v27 = vpop.permute.xlu0 %886 }
 0xfb1   :  { %v889_v28 = vmul.f32 %v1737_v10, %v887_v27  ;;  %v959_v29 = vpop.permute.xlu1 %958 }
 0xfb2   :  { %v961_v30 = vmul.f32 %v1739_v12, %v959_v29 }
 0xfb3   :  { %967 = vrot.lane.b32.xlu1 %v889_v28, %s1786_s1 }
 0xfb4   :  { %963 = vrot.lane.b32.xlu0 %v961_v30, %s1790_s18  ;;  %v1039_v32 = vpack.c.bf16 %v961_v30, %v961_v30 }
 0xfb8   :  { %1041 = vrot.lane.b32.xlu0 %v1039_v32, %s1790_s18 }
0x1025   :  { %v968_v33 = vpop.permute.xlu1 %967 }
0x1026   :  { %v964_v34 = vpop.permute.xlu0 %963 }
0x1027   :  { %v970_v35 = vsel %vm206_vm2, %v964_v34, %v968_v33 }
0x1028   :  { %v971_v4 = vpack.c.bf16 %v970_v35, %v970_v35 }
0x102a   :  { %1597 = vmatmul.mubr.msk.bf16.vlgmr.msra.gmra.mrb[20].mxu1 %vm371_vm3, %v971_v4  ;;  %v1042_v36 = vpop.permute.xlu0 %1041 }
0x102b   :  { %1605 = vmatmul.mubr.msk.bf16.vlgmr.msra.gmra.mrb[28].mxu0 %vm206_vm2, %v1042_v36  ;;  %1621 = vmatpush3.bf16.msra.mxu1 %v1886_v23  ;;  %v147_v23 = vadd.f32 %v1952_v5, %v1850_v3 }
0x102c   :  { %1609 = vmatpush3.bf16.msra.mxu0 %v1862_v17  ;;  %1622 = vmatprep.subr.bf16.mxu1 %v1787_v16 }
0x102d   :  { %1610 = vmatprep.subr.bf16.mxu0 %v1787_v16  ;;  %1616 = vmatprep.mubr.msk.bf16.mxu0 %vm1788_vm1, %v1787_v16 }
0x102e   :  { %1624 = vmatprep.mubr.msk.bf16.mxu1 %vm1788_vm1, %v1787_v16 }
0x102f   :  { %1623 = vmatpush3.bf16.msra.mxu1 %v1893_v25 }
0x1030   :  { %1611 = vmatpush3.bf16.msra.mxu0 %v1869_v18  ;;  %1628 = vmatprep.subr.bf16.mxu1 %v1787_v16 }
0x1031   :  { %1612 = vmatprep.subr.bf16.mxu0 %v1787_v16 }
0x1034   :  { %1613 = vmatpush3.bf16.msra.mxu0 %v1933_v59 }
0x1035   :  { %1614 = vmatprep.subr.bf16.mxu0 %v1787_v16 }
0x1038   :  { %1615 = vmatpush3.bf16.msra.mxu0 %v1940_v60 }
0x10fd   :  { %v1009_v37 = vpop.f32.mrb[20].mxu1 }
0x10fe   :  { %v1010_v38 = vadd.f32 %v1911_v31, %v1009_v37  ;;  %v1598_v39 = vpop.f32.mrb[21].mxu1  ;;  %v1080_v25 = vpop.f32.mrb[28].mxu0 }
0x10ff   :  { %v1086_v40 = vadd.f32 %v1080_v25, %v147_v23  ;;  %v1012_v41 = vpop.f32.mrb[22].mxu1  ;;  %v1606_v42 = vpop.f32.mrb[29].mxu0 }
0x1100   :  { %1744 = vtanh.f32 %v1010_v38  ;;  %v1599_v43 = vpop.f32.mrb[23].mxu1  ;;  %v1083_v44 = vpop.f32.mrb[30].mxu0  ;;  %v1407_v3 = vmul.f32 -1.442695, %v1010_v38 }
0x1101   :  { %1746 = vtanh.f32 %v1086_v40  ;;  %v1607_v45 = vpop.f32.mrb[31].mxu0  ;;  %v1409_v5 = vmul.f32 -1.442695, %v1086_v40 }
0x1102   :  { %1748 = vpow2.f32 %v1407_v3 }
0x1103   :  { %1750 = vpow2.f32 %v1409_v5 }
0x110a   :  { %v1745_v46 = vpop.eup %1744 }
0x110b   :  { %v1747_v47 = vpop.eup %1746  ;;  %1024 = vrot.lane.b32.xlu1 %v1745_v46, %s1786_s1 }
0x110c   :  { %1096 = vrot.lane.b32.xlu0 %v1747_v47, %s1786_s1  ;;  %v1749_v48 = vpop.eup %1748 }
0x110d   :  { %v1751_v49 = vpop.eup %1750  ;;  %v1018_v50 = vadd.f32 1.0, %v1749_v48 }
0x110e   :  { %v1090_v51 = vadd.f32 1.0, %v1751_v49 }
0x110f   :  { %1752 = vrcp.f32 %v1018_v50 }
0x1110   :  { %1754 = vrcp.f32 %v1090_v51 }
0x1119   :  { %v1753_v52 = vpop.eup %1752 }
0x111a   :  { %v1755_v54 = vpop.eup %1754  ;;  %v1022_v56 = vmul.f32 %v1753_v52, %v2106_v21 }
0x111b   :  { %v1094_v9 = vmul.f32 %v1755_v54, %v2108_v24 }
0x117d   :  { %v1025_v53 = vpop.permute.xlu1 %1024 }
0x117e   :  { %v1027_v55 = vmul.f32 %v1753_v52, %v1025_v53  ;;  %v1097_v57 = vpop.permute.xlu0 %1096 }
0x117f   :  { %v1099_v58 = vmul.f32 %v1755_v54, %v1097_v57 }
0x1180   :  { %1029 = vrot.lane.b32.xlu1 %v1027_v55, %s1790_s18  ;;  %v1785_v55 = vld [vmem:[%s2207_s5] ss:$0 sm:$0xff] }
0x1181   :  { %1101 = vrot.lane.b32.xlu0 %v1099_v58, %s1790_s18 }
0x11f2   :  { %v1030_v61 = vpop.permute.xlu1 %1029 }
0x11f3   :  { %v2144_v62 = vadd.f32 %v1030_v61, %v1022_v56  ;;  %v1102_v63 = vpop.permute.xlu0 %1101 }
0x11f4   :  { %v2146_v0 = vadd.f32 %v1102_v63, %v1094_v9 }
0x11f5   :  { %1756 = vtanh.f32 %v2144_v62 }
0x11f6   :  { %1758 = vtanh.f32 %v2146_v0 }
0x11ff   :  { %v1757_v1 = vpop.eup %1756 }
0x1200   :  { %v1759_v2 = vpop.eup %1758  ;;  %1035 = vrot.lane.b32.xlu1 %v1757_v1, %s1786_s1 }
0x1201   :  { %1107 = vrot.lane.b32.xlu0 %v1759_v2, %s1786_s1 }
0x1272   :  { %v1036_v10 = vpop.permute.xlu1 %1035 }
0x1273   :  { %v1038_v11 = vmul.f32 %v1753_v52, %v1036_v10  ;;  %v1108_v12 = vpop.permute.xlu0 %1107 }
0x1274   :  { %v1110_v13 = vmul.f32 %v1755_v54, %v1108_v12 }
0x1275   :  { %1116 = vrot.lane.b32.xlu0 %v1038_v11, %s1786_s1  ;;  %v1416_v11 = vld [vmem:[%s2208_s6] ss:$0 sm:$0xff] }
0x1276   :  { %1112 = vrot.lane.b32.xlu1 %v1110_v13, %s1790_s18  ;;  %v1188_v6 = vpack.c.bf16 %v1110_v13, %v1110_v13 }
0x127a   :  { %1190 = vrot.lane.b32.xlu1 %v1188_v6, %s1790_s18 }
0x12e7   :  { %v1117_v14 = vpop.permute.xlu0 %1116 }
0x12e8   :  { %v1113_v15 = vpop.permute.xlu1 %1112 }
0x12e9   :  { %v1119_v19 = vsel %vm206_vm2, %v1113_v15, %v1117_v14  ;;  %v13_v15 = vstv %s2209_s7 }
0x12ea   :  { %v1120_v20 = vpack.c.bf16 %v1119_v19, %v1119_v19  ;;  %14 = vst [vmem:[#allocation2] sm:$0x1] %v13_v15 }
0x12ec   :  { %v1191_v21 = vpop.permute.xlu1 %1190  ;;  %1617 = vmatmul.mubr.msk.bf16.vlgmr.msra.gmra.mrb[32].mxu0 %vm371_vm3, %v1120_v20 }
0x12ed   :  { %1625 = vmatmul.mubr.msk.bf16.vlgmr.msra.gmra.mrb[24].mxu1 %vm206_vm2, %v1191_v21 }
0x12ee   :  { %1629 = vmatpush3.bf16.msra.mxu1 %v1862_v17  ;;  %1636 = vmatprep.mubr.msk.bf16.mxu1 %vm1788_vm1, %v1787_v16  ;;  %v150_v17 = vadd.f32 %v1784_v22, %v1956_v8 }
0x12ef   :  { %1630 = vmatprep.subr.bf16.mxu1 %v1787_v16 }
0x12f2   :  { %1631 = vmatpush3.bf16.msra.mxu1 %v1869_v18 }
0x12f3   :  { %1632 = vmatprep.subr.bf16.mxu1 %v1787_v16 }
0x12f6   :  { %1633 = vmatpush3.bf16.msra.mxu1 %v1933_v59 }
0x12f7   :  { %1634 = vmatprep.subr.bf16.mxu1 %v1787_v16 }
0x12fa   :  { %1635 = vmatpush3.bf16.msra.mxu1 %v1940_v60 }
0x13bf   :  { %v1158_v24 = vpop.f32.mrb[32].mxu0 }
0x13c0   :  { %v1159_v26 = vadd.f32 %v1911_v31, %v1158_v24  ;;  %v1618_v7 = vpop.f32.mrb[33].mxu0  ;;  %v1229_v27 = vpop.f32.mrb[24].mxu1 }
0x13c1   :  { %v1235_v18 = vadd.f32 %v1229_v27, %v150_v17  ;;  %v1161_v28 = vpop.f32.mrb[34].mxu0  ;;  %v1626_v29 = vpop.f32.mrb[25].mxu1 }
0x13c2   :  { %1760 = vtanh.f32 %v1159_v26  ;;  %v1619_v59 = vpop.f32.mrb[35].mxu0  ;;  %v1232_v30 = vpop.f32.mrb[26].mxu1  ;;  %v1411_v8 = vmul.f32 -1.442695, %v1159_v26  ;;  %v1417_v26 = vld [vmem:[#allocation2] ss:$0 sm:$0xff] }
0x13c3   :  { %1762 = vtanh.f32 %v1235_v18  ;;  %v1627_v16 = vpop.f32.mrb[27].mxu1  ;;  %v1413_v33 = vmul.f32 -1.442695, %v1235_v18 }
0x13c4   :  { %1764 = vpow2.f32 %v1411_v8 }
0x13c5   :  { %1766 = vpow2.f32 %v1413_v33 }
0x13cc   :  { %v1761_v60 = vpop.eup %1760 }
0x13cd   :  { %v1763_v32 = vpop.eup %1762  ;;  %1173 = vrot.lane.b32.xlu0 %v1761_v60, %s1786_s1 }
0x13ce   :  { %1245 = vrot.lane.b32.xlu1 %v1763_v32, %s1786_s1  ;;  %v1765_v31 = vpop.eup %1764 }
0x13cf   :  { %v1767_v34 = vpop.eup %1766  ;;  %v1167_v35 = vadd.f32 1.0, %v1765_v31 }
0x13d0   :  { %v1239_v4 = vadd.f32 1.0, %v1767_v34 }
0x13d1   :  { %1768 = vrcp.f32 %v1167_v35 }
0x13d2   :  { %1770 = vrcp.f32 %v1239_v4 }
0x13db   :  { %v1769_v36 = vpop.eup %1768 }
0x13dc   :  { %v1771_v37 = vpop.eup %1770  ;;  %v1171_v40 = vmul.f32 %v1769_v36, %v2144_v62 }
0x13dd   :  { %v1243_v42 = vmul.f32 %v1771_v37, %v2146_v0 }
0x143f   :  { %v1174_v23 = vpop.permute.xlu0 %1173 }
0x1440   :  { %v1176_v38 = vmul.f32 %v1769_v36, %v1174_v23  ;;  %v1246_v39 = vpop.permute.xlu1 %1245 }
0x1441   :  { %v1248_v25 = vmul.f32 %v1771_v37, %v1246_v39 }
0x1442   :  { %1178 = vrot.lane.b32.xlu0 %v1176_v38, %s1790_s18 }
0x1443   :  { %1250 = vrot.lane.b32.xlu1 %v1248_v25, %s1790_s18 }
0x14b4   :  { %v1179_v41 = vpop.permute.xlu0 %1178 }
0x14b5   :  { %v1181_v43 = vadd.f32 %v1179_v41, %v1171_v40  ;;  %v1251_v44 = vpop.permute.xlu1 %1250 }
0x14b6   :  { %v1253_v45 = vadd.f32 %v1251_v44, %v1243_v42 }
0x14b7   :  { %1772 = vtanh.f32 %v1181_v43 }
0x14b8   :  { %1774 = vtanh.f32 %v1253_v45 }
0x14c1   :  { %v1773_v46 = vpop.eup %1772 }
0x14c2   :  { %v1775_v47 = vpop.eup %1774  ;;  %1184 = vrot.lane.b32.xlu0 %v1773_v46, %s1786_s1 }
0x14c3   :  { %1256 = vrot.lane.b32.xlu1 %v1775_v47, %s1786_s1 }
0x1534   :  { %v1185_v3 = vpop.permute.xlu0 %1184 }
0x1535   :  { %v1187_v5 = vmul.f32 %v1769_v36, %v1185_v3  ;;  %v1257_v48 = vpop.permute.xlu1 %1256 }
0x1536   :  { %v1259_v49 = vmul.f32 %v1771_v37, %v1257_v48 }
0x1537   :  { %1265 = vrot.lane.b32.xlu1 %v1187_v5, %s1786_s1 }
0x1538   :  { %1261 = vrot.lane.b32.xlu0 %v1259_v49, %s1790_s18 }
0x15a9   :  { %v1266_v50 = vpop.permute.xlu1 %1265 }
0x15aa   :  { %v1262_v51 = vpop.permute.xlu0 %1261 }
0x15ab   :  { %v1268_v52 = vsel %vm206_vm2, %v1262_v51, %v1266_v50 }
0x15ac   :  { %v1269_v53 = vpack.c.bf16 %v1268_v52, %v1268_v52 }
0x15ae   :  { %1637 = vmatmul.mubr.msk.bf16.vlgmr.msra.gmra.mrb[28].mxu1 %vm371_vm3, %v1269_v53 }
0x1681   :  { %v1307_v54 = vpop.f32.mrb[28].mxu1 }
0x1682   :  { %v1308_v57 = vadd.f32 %v1785_v55, %v1307_v54  ;;  %v1638_v58 = vpop.f32.mrb[29].mxu1 }
0x1683   :  { %v1310_v56 = vpop.f32.mrb[30].mxu1 }
0x1684   :  { %1776 = vtanh.f32 %v1308_v57  ;;  %v1639_v61 = vpop.f32.mrb[31].mxu1  ;;  %v1415_v62 = vmul.f32 -1.442695, %v1308_v57 }
0x1686   :  { %1778 = vpow2.f32 %v1415_v62 }
0x168e   :  { %v1777_v9 = vpop.eup %1776 }
0x168f   :  { %1322 = vrot.lane.b32.xlu0 %v1777_v9, %s1786_s1 }
0x1690   :  { %v1779_v63 = vpop.eup %1778 }
0x1691   :  { %v1316_v0 = vadd.f32 1.0, %v1779_v63 }
0x1693   :  { %1780 = vrcp.f32 %v1316_v0 }
0x169d   :  { %v1781_v1 = vpop.eup %1780 }
0x169e   :  { %v1320_v12 = vmul.f32 %v1781_v1, %v1181_v43 }
0x1701   :  { %v1323_v2 = vpop.permute.xlu0 %1322 }
0x1702   :  { %v1325_v10 = vmul.f32 %v1781_v1, %v1323_v2 }
0x1704   :  { %1327 = vrot.lane.b32.xlu1 %v1325_v10, %s1790_s18 }
0x1708   :  { %1343 = vrot.lane.b32.xlu1 %v1416_v11, %s1789_s17 }
0x1776   :  { %v1328_v13 = vpop.permute.xlu1 %1327 }
0x1777   :  { %v1330_v6 = vadd.f32 %v1328_v13, %v1320_v12 }
0x1779   :  { %1782 = vtanh.f32 %v1330_v6 }
0x177a   :  { %v1344_v20 = vpop.permute.xlu1 %1343 }
0x1783   :  { %v1783_v14 = vpop.eup %1782 }
0x1784   :  { %1333 = vrot.lane.b32.xlu0 %v1783_v14, %s1786_s1 }
0x17f6   :  { %v1334_v19 = vpop.permute.xlu0 %1333 }
0x17f7   :  { %v1336_v21 = vmul.f32 %v1781_v1, %v1334_v19 }
0x17f9   :  { %v1346_v22 = vmul.f32 %v1344_v20, %v1336_v21 }
0x17fb   :  { %1348 = vrot.lane.b32.xlu0 %v1346_v22, %s1790_s18 }
0x186d   :  { %v1349_v17 = vpop.permute.xlu0 %1348 }
0x186e   :  { %v1351_v24 = vsel %vm206_vm2, %v1349_v17, 0.0 }
0x186f   :  { %1352 = vadd.xlane.f32.xlu1 %v1351_v24 }
0x18fc   :  { %v1353_v7 = vpop.xlane.xlu1 %1352 }
0x18fd   :  { %v1361_v27 = vadd.f32 %v1417_v26, %v1353_v7 }
0x18ff   :  { %1363 = vst.msk [vmem:[%s2210_s8] sm:$0xff] %vm1362_vm4, %v1361_v27 }

</bundles_post_ra>
